<compile_context>
chip_gen: v5e
topology: v5e:2x2
jax: 0.10.0
libtpu: 0.0.40
codegen_flags: <defaults>
</compile_context>

<pallas_src>
import numpy as np

import jax
import jax.numpy as jnp
from jax import lax
from jax.experimental import pallas as pl
from jax.experimental.pallas import tpu as pltpu


NBF = 32          # static channel count
NBCLASSES = 5
IMG = 31
P1 = 15 * 15      # conv1 output positions (15x15)
P2 = 7 * 7        # conv2 output positions (7x7)
P3 = 3 * 3        # conv3 output positions (3x3)
PAD2 = 56         # 49 padded up to a multiple of 8 (sublane-aligned slices)
PAD3 = 16         # 9 padded up to a multiple of 8


# ----------------------------------------------------------------------------
# Stacked 0/1 selection matrices for the in-VMEM im2col gather:
#   S[t*pad + p_out, p_in] = 1  iff input spatial position p_in feeds output
# position p_out at kernel tap t = kh*3 + kw (3x3 conv, stride 2, VALID).
# One matmul  S_stacked @ a_prev  gathers all 9 taps at once; tap t's rows
# live at [t*pad, t*pad + P_out) so static slices stay sublane-aligned.
# ----------------------------------------------------------------------------
def _stacked_selection(h_in, w_in, h_out, w_out, pad):
    S = np.zeros((9 * pad, h_in * w_in), np.float32)
    for kh in range(3):
        for kw in range(3):
            t = kh * 3 + kw
            for oh in range(h_out):
                for ow in range(w_out):
                    p_out = oh * w_out + ow
                    p_in = (2 * oh + kh) * w_in + (2 * ow + kw)
                    S[t * pad + p_out, p_in] = 1.0
    return S


_S2 = _stacked_selection(15, 15, 7, 7, PAD2)   # (504, 225)
_S3 = _stacked_selection(7, 7, 3, 3, PAD3)     # (144, 49)


# ----------------------------------------------------------------------------
# Fused per-step kernel, iterated over the episode via the grid.
# One grid step = one call of the original module's forward().
# ----------------------------------------------------------------------------
def _episode_kernel(eta_ref,                       # SMEM (1,)
                    patches_ref, label_ref,        # per-step (225,9) / (1,5)
                    w1_ref, b1_ref,
                    s2_ref, w2_ref, b2_ref,
                    s3_ref, w3_ref, b3_ref,
                    w4_ref, b4_ref,
                    w_ref, alpha_ref, eye_ref, hebb0_ref,
                    out_ref, hebb_out_ref,         # outputs
                    hebb_acc):                     # VMEM scratch (NBF, NBC)
    f32 = jnp.float32
    step = pl.program_id(0)

    @pl.when(step == 0)
    def _():
        hebb_acc[...] = hebb0_ref[...]

    # ---- conv1: 31x31x1 -> 15x15xNBF (im2col patches built in the wrapper) --
    a1 = jnp.tanh(
        jnp.dot(patches_ref[...], w1_ref[...], preferred_element_type=f32)
        + b1_ref[...])                                         # (225, NBF)

    # ---- conv2 / conv3: ONE stacked gather matmul + 9 channel matmuls ------
    def conv_layer(a_prev, s_ref, w_tap_ref, b_ref_, p_out, pad):
        g = jnp.dot(s_ref[...], a_prev,
                    preferred_element_type=f32)                # (9*pad, Cin)
        acc = None
        for t in range(9):
            blk = g[t * pad:t * pad + p_out, :]                # sublane-aligned
            term = jnp.dot(blk, w_tap_ref[t],
                           preferred_element_type=f32)         # (P_out, Cout)
            acc = term if acc is None else acc + term
        return jnp.tanh(acc + b_ref_[...])

    a2 = conv_layer(a1, s2_ref, w2_ref, b2_ref, P2, PAD2)      # (49, NBF)
    a3 = conv_layer(a2, s3_ref, w3_ref, b3_ref, P3, PAD3)      # (9,  NBF)

    # ---- conv4: 1x1 output -> gather is the identity, no s4 needed ---------
    acc4 = None
    for t in range(9):
        term = jnp.dot(a3[t:t + 1, :], w4_ref[t],
                       preferred_element_type=f32)             # (1, NBF)
        acc4 = term if acc4 is None else acc4 + term
    activin = jnp.tanh(acc4 + b4_ref[...])                     # (1, NBF)

    # ---- plastic readout: logits / softmax ----------------------------------
    hebb = hebb_acc[...]                                       # (NBF, NBC)
    w_eff = w_ref[...] + alpha_ref[...] * hebb                 # alpha == 'free'
    logits = (jnp.dot(activin, w_eff, preferred_element_type=f32)
              + 1000.0 * label_ref[...])                       # (1, NBC)
    m = jnp.max(logits, axis=-1, keepdims=True)
    e = jnp.exp(logits - m)
    prob = e * pl.reciprocal(jnp.sum(e, axis=-1, keepdims=True), approx=True)
    out_ref[...] = prob

    # ---- Hebbian update (rule == 'hebb', batch = 1) --------------------------
    # outer[i, j] = activin[0, i] * prob[0, j].  activin's lanes are routed to
    # sublanes with one identity-weighted MXU matmul (eye is a precomputed
    # resident constant; the matmul only depends on activin, so it overlaps
    # the softmax), then a VPU broadcast multiply with prob finishes the outer
    # product.
    x_cols = jnp.dot(eye_ref[...] * activin,
                     jnp.ones((NBF, NBCLASSES), f32),
                     preferred_element_type=f32)               # [i, j] = activin[0, i]
    outer = x_cols * prob                                      # (NBF, NBC)

    eta = eta_ref[0]
    new_hebb = (1.0 - eta) * hebb + eta * outer
    hebb_acc[...] = new_hebb
    hebb_out_ref[...] = new_hebb


def _const_spec(shape):
    """Full-array block with a constant index map: stays VMEM-resident."""
    if len(shape) == 2:
        return pl.BlockSpec(shape, lambda t: (0, 0))
    return pl.BlockSpec(shape, lambda t: (0, 0, 0))


# ----------------------------------------------------------------------------
# Episode wrapper: T sequential forward() steps in ONE pallas_call.
#   images: (T, 1, 1, 31, 31), labels: (T, 1, NBCLASSES), hebb: (NBF, NBCLASSES)
# Returns per-step softmax outputs (T, 1, NBCLASSES) and the final hebb.
# ----------------------------------------------------------------------------
def network_forward_episode(params, images, labels, hebb):
    T = images.shape[0]
    assert images.shape == (T, 1, 1, IMG, IMG)
    assert labels.shape == (T, 1, NBCLASSES)

    # Layer-1 im2col for all steps (tap order kh*3 + kw), done on the XLA side.
    x = images[:, 0, 0]                                        # (T, 31, 31)
    cols = []
    for kh in range(3):
        for kw in range(3):
            cols.append(x[:, kh:kh + 29:2, kw:kw + 29:2].reshape(T, P1))
    patches = jnp.stack(cols, axis=-1).astype(jnp.float32)     # (T, 225, 9)

    # Weight re-layouts: per-tap (Cin, Cout) blocks, tap = kh*3 + kw.
    def tap_weights(wc):                                       # (Cout,Cin,3,3)
        cout, cin = wc.shape[0], wc.shape[1]
        return jnp.transpose(wc, (2, 3, 1, 0)).reshape(9, cin, cout)

    w1 = params['cv1_w'].reshape(NBF, 9).T                     # (9, NBF)
    b1 = params['cv1_b'].reshape(1, NBF)
    w2 = tap_weights(params['cv2_w']); b2 = params['cv2_b'].reshape(1, NBF)
    w3 = tap_weights(params['cv3_w']); b3 = params['cv3_b'].reshape(1, NBF)
    w4 = tap_weights(params['cv4_w']); b4 = params['cv4_b'].reshape(1, NBF)

    s2 = jnp.asarray(_S2)                                      # (504, 225)
    s3 = jnp.asarray(_S3)                                      # (144, 49)
    eye = jnp.eye(NBF, dtype=jnp.float32)                      # (NBF, NBF)

    in_specs = [
        pl.BlockSpec(memory_space=pltpu.MemorySpace.SMEM),             # eta
        pl.BlockSpec((None, P1, 9), lambda t: (t, 0, 0)),              # patches
        pl.BlockSpec((None, 1, NBCLASSES), lambda t: (t, 0, 0)),       # labels
        _const_spec(w1.shape), _const_spec(b1.shape),
        _const_spec(s2.shape), _const_spec(w2.shape), _const_spec(b2.shape),
        _const_spec(s3.shape), _const_spec(w3.shape), _const_spec(b3.shape),
        _const_spec(w4.shape), _const_spec(b4.shape),
        _const_spec(params['w'].shape), _const_spec(params['alpha'].shape),
        _const_spec(eye.shape), _const_spec(hebb.shape),
    ]
    out_specs = (
        pl.BlockSpec((None, 1, NBCLASSES), lambda t: (t, 0, 0)),       # probs
        pl.BlockSpec((NBF, NBCLASSES), lambda t: (0, 0)),              # hebb
    )
    out_shape = (jax.ShapeDtypeStruct((T, 1, NBCLASSES), jnp.float32),
                 jax.ShapeDtypeStruct((NBF, NBCLASSES), jnp.float32))

    activout, new_hebb = pl.pallas_call(
        _episode_kernel,
        grid=(T,),
        in_specs=in_specs,
        out_specs=out_specs,
        out_shape=out_shape,
        scratch_shapes=[pltpu.VMEM((NBF, NBCLASSES), jnp.float32)],
        input_output_aliases={16: 1},      # carried hebb -> final hebb
        compiler_params=pltpu.CompilerParams(
            dimension_semantics=("arbitrary",)),   # sequential recurrence
    )(params['eta'], patches, labels,
      w1, b1, s2, w2, b2, s3, w3, b3, w4, b4,
      params['w'], params['alpha'], eye, hebb)

    return activout, new_hebb


# Single-step interface matching the original module's forward().
def network_forward(params, inputx, inputlabel, hebb):
    probs, new_hebb = network_forward_episode(
        params, inputx[None], inputlabel[None], hebb)
    return probs[0], new_hebb


# ----------------------------------------------------------------------------
# Pure-JAX reference (episode loop) for a numerical sanity check.
# ----------------------------------------------------------------------------
def _reference_episode(params, images, labels, hebb0):
    prec = lax.Precision.HIGHEST

    def conv(x, w, b):
        y = lax.conv_general_dilated(
            x, w, window_strides=(2, 2), padding='VALID',
            dimension_numbers=('NCHW', 'OIHW', 'NCHW'), precision=prec)
        return jnp.tanh(y + b.reshape(1, -1, 1, 1))

    def step(hebb, xl):
        xt, lt = xl                                            # (1,1,31,31), (1,5)
        a = conv(xt, params['cv1_w'], params['cv1_b'])
        a = conv(a, params['cv2_w'], params['cv2_b'])
        a = conv(a, params['cv3_w'], params['cv3_b'])
        a = conv(a, params['cv4_w'], params['cv4_b'])
        activin = a.reshape(1, NBF)
        logits = (jnp.dot(activin, params['w'] + params['alpha'] * hebb,
                          precision=prec) + 1000.0 * lt)
        prob = jax.nn.softmax(logits, axis=-1)
        eta = params['eta']
        hebb = (1.0 - eta) * hebb + eta * jnp.dot(activin.T, prob, precision=prec)
        return hebb, prob

    hebb_T, probs = lax.scan(step, hebb0, (images, labels))
    return probs, hebb_T


if __name__ == "__main__":
    key = jax.random.PRNGKey(0)
    ks = jax.random.split(key, 12)
    T = 8                                                      # episode length

    params = {
        'cv1_w': 0.1 * jax.random.normal(ks[0], (NBF, 1, 3, 3), jnp.float32),
        'cv1_b': 0.1 * jax.random.normal(ks[1], (NBF,), jnp.float32),
        'cv2_w': 0.1 * jax.random.normal(ks[2], (NBF, NBF, 3, 3), jnp.float32),
        'cv2_b': 0.1 * jax.random.normal(ks[3], (NBF,), jnp.float32),
        'cv3_w': 0.1 * jax.random.normal(ks[4], (NBF, NBF, 3, 3), jnp.float32),
        'cv3_b': 0.1 * jax.random.normal(ks[5], (NBF,), jnp.float32),
        'cv4_w': 0.1 * jax.random.normal(ks[6], (NBF, NBF, 3, 3), jnp.float32),
        'cv4_b': 0.1 * jax.random.normal(ks[7], (NBF,), jnp.float32),
        'w':     0.01 * jax.random.normal(ks[8], (NBF, NBCLASSES), jnp.float32),
        'alpha': 0.01 * jax.random.uniform(ks[9], (NBF, NBCLASSES), jnp.float32),
        'eta':   0.01 * jnp.ones((1,), jnp.float32),
    }

    # T Omniglot-style 1x31x31 images; one-hot labels for the "training"
    # steps and a zero label for the final query step; zero initial Hebbian.
    images = jax.random.normal(ks[10], (T, 1, 1, IMG, IMG), jnp.float32)
    lab_idx = jax.random.randint(ks[11], (T,), 0, NBCLASSES)
    labels = jax.nn.one_hot(lab_idx, NBCLASSES, dtype=jnp.float32)[:, None, :]
    labels = labels.at[-1].set(0.0)                            # query step
    hebb0 = jnp.zeros((NBF, NBCLASSES), jnp.float32)           # initialZeroHebb

    fwd = jax.jit(network_forward_episode)
    activout, new_hebb = fwd(params, images, labels, hebb0)
    jax.block_until_ready((activout, new_hebb))

    assert activout.shape == (T, 1, NBCLASSES)
    assert new_hebb.shape == (NBF, NBCLASSES)

    # Numerical sanity check of the whole episode against a pure-JAX reference.
    ref_out, ref_hebb = jax.jit(_reference_episode)(params, images, labels, hebb0)
    np.testing.assert_allclose(np.asarray(activout), np.asarray(ref_out),
                               rtol=2e-3, atol=2e-3)
    np.testing.assert_allclose(np.asarray(new_hebb), np.asarray(ref_hebb),
                               rtol=2e-3, atol=2e-3)

    # Single-step (original module interface) check as well.
    one_out, one_hebb = network_forward(params, images[0], labels[0], hebb0)
    r1_out, r1_hebb = jax.jit(_reference_episode)(params, images[:1],
                                                  labels[:1], hebb0)
    np.testing.assert_allclose(np.asarray(one_out), np.asarray(r1_out[0]),
                               rtol=2e-3, atol=2e-3)
    np.testing.assert_allclose(np.asarray(one_hebb), np.asarray(r1_hebb),
                               rtol=2e-3, atol=2e-3)

    print("KERNEL_OK")
</pallas_src>

<mosaic_0001>
module attributes {stable_mosaic.version = 11 : i64} {
  func.func @_episode_kernel(%arg0: i32, %arg1: memref<1xf32, #tpu.memory_space<smem>>, %arg2: memref<1x225x9xf32, #tpu.memory_space<vmem>>, %arg3: memref<1x1x5xf32, #tpu.memory_space<vmem>>, %arg4: memref<9x32xf32, #tpu.memory_space<vmem>>, %arg5: memref<1x32xf32, #tpu.memory_space<vmem>>, %arg6: memref<504x225xf32, #tpu.memory_space<vmem>>, %arg7: memref<9x32x32xf32, #tpu.memory_space<vmem>>, %arg8: memref<1x32xf32, #tpu.memory_space<vmem>>, %arg9: memref<144x49xf32, #tpu.memory_space<vmem>>, %arg10: memref<9x32x32xf32, #tpu.memory_space<vmem>>, %arg11: memref<1x32xf32, #tpu.memory_space<vmem>>, %arg12: memref<9x32x32xf32, #tpu.memory_space<vmem>>, %arg13: memref<1x32xf32, #tpu.memory_space<vmem>>, %arg14: memref<32x5xf32, #tpu.memory_space<vmem>>, %arg15: memref<32x5xf32, #tpu.memory_space<vmem>>, %arg16: memref<32x32xf32, #tpu.memory_space<vmem>>, %arg17: memref<32x5xf32, #tpu.memory_space<vmem>>, %arg18: memref<1x1x5xf32, #tpu.memory_space<vmem>>, %arg19: memref<32x5xf32, #tpu.memory_space<vmem>>, %arg20: memref<32x5xf32, #tpu.memory_space<vmem>>) attributes {dimension_semantics = [#tpu.dimension_semantics<arbitrary>], iteration_bounds = array<i64: 8>, scalar_prefetch = 0 : i64, scratch_operands = 1 : i64, tpu.core_type = #tpu.core_type<tc>, window_params = [{transform_indices = @transform_0, window_bounds = array<i64: 1>}, {transform_indices = @transform_1, window_bounds = array<i64: 1, 225, 9>}, {transform_indices = @transform_2, window_bounds = array<i64: 1, 1, 5>}, {pipeline_mode = #tpu.pipeline_mode<synchronous>, transform_indices = @transform_3, window_bounds = array<i64: 9, 32>}, {pipeline_mode = #tpu.pipeline_mode<synchronous>, transform_indices = @transform_4, window_bounds = array<i64: 1, 32>}, {pipeline_mode = #tpu.pipeline_mode<synchronous>, transform_indices = @transform_5, window_bounds = array<i64: 504, 225>}, {pipeline_mode = #tpu.pipeline_mode<synchronous>, transform_indices = @transform_6, window_bounds = array<i64: 9, 32, 32>}, {pipeline_mode = #tpu.pipeline_mode<synchronous>, transform_indices = @transform_7, window_bounds = array<i64: 1, 32>}, {pipeline_mode = #tpu.pipeline_mode<synchronous>, transform_indices = @transform_8, window_bounds = array<i64: 144, 49>}, {pipeline_mode = #tpu.pipeline_mode<synchronous>, transform_indices = @transform_9, window_bounds = array<i64: 9, 32, 32>}, {pipeline_mode = #tpu.pipeline_mode<synchronous>, transform_indices = @transform_10, window_bounds = array<i64: 1, 32>}, {pipeline_mode = #tpu.pipeline_mode<synchronous>, transform_indices = @transform_11, window_bounds = array<i64: 9, 32, 32>}, {pipeline_mode = #tpu.pipeline_mode<synchronous>, transform_indices = @transform_12, window_bounds = array<i64: 1, 32>}, {pipeline_mode = #tpu.pipeline_mode<synchronous>, transform_indices = @transform_13, window_bounds = array<i64: 32, 5>}, {pipeline_mode = #tpu.pipeline_mode<synchronous>, transform_indices = @transform_14, window_bounds = array<i64: 32, 5>}, {pipeline_mode = #tpu.pipeline_mode<synchronous>, transform_indices = @transform_15, window_bounds = array<i64: 32, 32>}, {pipeline_mode = #tpu.pipeline_mode<synchronous>, transform_indices = @transform_16, window_bounds = array<i64: 32, 5>}, {transform_indices = @transform_17, window_bounds = array<i64: 1, 1, 5>}, {pipeline_mode = #tpu.pipeline_mode<synchronous>, transform_indices = @transform_18, window_bounds = array<i64: 32, 5>}]} {
    %c0_i32 = arith.constant 0 : i32
    %0 = arith.cmpi eq, %arg0, %c0_i32 : i32
    %1 = arith.extui %0 : i1 to i32
    %c0_i32_0 = arith.constant 0 : i32
    %2 = arith.cmpi ne, %1, %c0_i32_0 : i32
    scf.if %2 {
      %c0_145 = arith.constant 0 : index
      %c0_146 = arith.constant 0 : index
      %198 = vector.load %arg17[%c0_145, %c0_146] : memref<32x5xf32, #tpu.memory_space<vmem>>, vector<32x5xf32>
      %c0_147 = arith.constant 0 : index
      %c0_148 = arith.constant 0 : index
      %199 = vector.load %arg20[%c0_147, %c0_148] : memref<32x5xf32, #tpu.memory_space<vmem>>, vector<32x5xf32>
      tpu.vector_store %arg20[%c0_147, %c0_148], %198 {strides = array<i32>} : memref<32x5xf32, #tpu.memory_space<vmem>>, vector<32x5xf32>,
    } else {
    }
    %c0 = arith.constant 0 : index
    %c0_1 = arith.constant 0 : index
    %c0_2 = arith.constant 0 : index
    %3 = vector.load %arg2[%c0, %c0_1, %c0_2] : memref<1x225x9xf32, #tpu.memory_space<vmem>>, vector<1x225x9xf32>
    %4 = vector.shape_cast %3 : vector<1x225x9xf32> to vector<225x9xf32>
    %c0_3 = arith.constant 0 : index
    %c0_4 = arith.constant 0 : index
    %5 = vector.load %arg4[%c0_3, %c0_4] : memref<9x32xf32, #tpu.memory_space<vmem>>, vector<9x32xf32>
    %cst = arith.constant dense<0.000000e+00> : vector<225x32xf32>
    %6 = tpu.matmul %4, %5, %cst {dimension_numbers = #tpu.dot_dimension_numbers<[1], [0], [0], [1], [0, 0, 1, 1], [], []>} : vector<225x9xf32>, vector<9x32xf32>, vector<225x32xf32> -> vector<225x32xf32>
    %c0_5 = arith.constant 0 : index
    %c0_6 = arith.constant 0 : index
    %7 = vector.load %arg5[%c0_5, %c0_6] : memref<1x32xf32, #tpu.memory_space<vmem>>, vector<1x32xf32>
    %8 = vector.broadcast %7 : vector<1x32xf32> to vector<225x32xf32>
    %9 = arith.addf %6, %8 : vector<225x32xf32>
    %10 = math.tanh %9 : vector<225x32xf32>
    %c0_7 = arith.constant 0 : index
    %c0_8 = arith.constant 0 : index
    %11 = vector.load %arg6[%c0_7, %c0_8] : memref<504x225xf32, #tpu.memory_space<vmem>>, vector<504x225xf32>
    %cst_9 = arith.constant dense<0.000000e+00> : vector<504x32xf32>
    %12 = tpu.matmul %11, %10, %cst_9 {dimension_numbers = #tpu.dot_dimension_numbers<[1], [0], [0], [1], [0, 0, 1, 1], [], []>} : vector<504x225xf32>, vector<225x32xf32>, vector<504x32xf32> -> vector<504x32xf32>
    %13 = vector.extract_strided_slice %12 {offsets = [0, 0], sizes = [49, 32], strides = [1, 1]} : vector<504x32xf32> to vector<49x32xf32>
    %c0_10 = arith.constant 0 : index
    %c0_11 = arith.constant 0 : index
    %c0_12 = arith.constant 0 : index
    %14 = vector.load %arg7[%c0_10, %c0_11, %c0_12] : memref<9x32x32xf32, #tpu.memory_space<vmem>>, vector<1x32x32xf32>
    %15 = vector.shape_cast %14 : vector<1x32x32xf32> to vector<32x32xf32>
    %cst_13 = arith.constant dense<0.000000e+00> : vector<49x32xf32>
    %16 = tpu.matmul %13, %15, %cst_13 {dimension_numbers = #tpu.dot_dimension_numbers<[1], [0], [0], [1], [0, 0, 1, 1], [], []>} : vector<49x32xf32>, vector<32x32xf32>, vector<49x32xf32> -> vector<49x32xf32>
    %17 = vector.extract_strided_slice %12 {offsets = [56, 0], sizes = [49, 32], strides = [1, 1]} : vector<504x32xf32> to vector<49x32xf32>
    %c1 = arith.constant 1 : index
    %c0_14 = arith.constant 0 : index
    %c0_15 = arith.constant 0 : index
    %18 = vector.load %arg7[%c1, %c0_14, %c0_15] : memref<9x32x32xf32, #tpu.memory_space<vmem>>, vector<1x32x32xf32>
    %19 = vector.shape_cast %18 : vector<1x32x32xf32> to vector<32x32xf32>
    %cst_16 = arith.constant dense<0.000000e+00> : vector<49x32xf32>
    %20 = tpu.matmul %17, %19, %cst_16 {dimension_numbers = #tpu.dot_dimension_numbers<[1], [0], [0], [1], [0, 0, 1, 1], [], []>} : vector<49x32xf32>, vector<32x32xf32>, vector<49x32xf32> -> vector<49x32xf32>
    %21 = arith.addf %16, %20 : vector<49x32xf32>
    %22 = vector.extract_strided_slice %12 {offsets = [112, 0], sizes = [49, 32], strides = [1, 1]} : vector<504x32xf32> to vector<49x32xf32>
    %c2 = arith.constant 2 : index
    %c0_17 = arith.constant 0 : index
    %c0_18 = arith.constant 0 : index
    %23 = vector.load %arg7[%c2, %c0_17, %c0_18] : memref<9x32x32xf32, #tpu.memory_space<vmem>>, vector<1x32x32xf32>
    %24 = vector.shape_cast %23 : vector<1x32x32xf32> to vector<32x32xf32>
    %cst_19 = arith.constant dense<0.000000e+00> : vector<49x32xf32>
    %25 = tpu.matmul %22, %24, %cst_19 {dimension_numbers = #tpu.dot_dimension_numbers<[1], [0], [0], [1], [0, 0, 1, 1], [], []>} : vector<49x32xf32>, vector<32x32xf32>, vector<49x32xf32> -> vector<49x32xf32>
    %26 = arith.addf %21, %25 : vector<49x32xf32>
    %27 = vector.extract_strided_slice %12 {offsets = [168, 0], sizes = [49, 32], strides = [1, 1]} : vector<504x32xf32> to vector<49x32xf32>
    %c3 = arith.constant 3 : index
    %c0_20 = arith.constant 0 : index
    %c0_21 = arith.constant 0 : index
    %28 = vector.load %arg7[%c3, %c0_20, %c0_21] : memref<9x32x32xf32, #tpu.memory_space<vmem>>, vector<1x32x32xf32>
    %29 = vector.shape_cast %28 : vector<1x32x32xf32> to vector<32x32xf32>
    %cst_22 = arith.constant dense<0.000000e+00> : vector<49x32xf32>
    %30 = tpu.matmul %27, %29, %cst_22 {dimension_numbers = #tpu.dot_dimension_numbers<[1], [0], [0], [1], [0, 0, 1, 1], [], []>} : vector<49x32xf32>, vector<32x32xf32>, vector<49x32xf32> -> vector<49x32xf32>
    %31 = arith.addf %26, %30 : vector<49x32xf32>
    %32 = vector.extract_strided_slice %12 {offsets = [224, 0], sizes = [49, 32], strides = [1, 1]} : vector<504x32xf32> to vector<49x32xf32>
    %c4 = arith.constant 4 : index
    %c0_23 = arith.constant 0 : index
    %c0_24 = arith.constant 0 : index
    %33 = vector.load %arg7[%c4, %c0_23, %c0_24] : memref<9x32x32xf32, #tpu.memory_space<vmem>>, vector<1x32x32xf32>
    %34 = vector.shape_cast %33 : vector<1x32x32xf32> to vector<32x32xf32>
    %cst_25 = arith.constant dense<0.000000e+00> : vector<49x32xf32>
    %35 = tpu.matmul %32, %34, %cst_25 {dimension_numbers = #tpu.dot_dimension_numbers<[1], [0], [0], [1], [0, 0, 1, 1], [], []>} : vector<49x32xf32>, vector<32x32xf32>, vector<49x32xf32> -> vector<49x32xf32>
    %36 = arith.addf %31, %35 : vector<49x32xf32>
    %37 = vector.extract_strided_slice %12 {offsets = [280, 0], sizes = [49, 32], strides = [1, 1]} : vector<504x32xf32> to vector<49x32xf32>
    %c5 = arith.constant 5 : index
    %c0_26 = arith.constant 0 : index
    %c0_27 = arith.constant 0 : index
    %38 = vector.load %arg7[%c5, %c0_26, %c0_27] : memref<9x32x32xf32, #tpu.memory_space<vmem>>, vector<1x32x32xf32>
    %39 = vector.shape_cast %38 : vector<1x32x32xf32> to vector<32x32xf32>
    %cst_28 = arith.constant dense<0.000000e+00> : vector<49x32xf32>
    %40 = tpu.matmul %37, %39, %cst_28 {dimension_numbers = #tpu.dot_dimension_numbers<[1], [0], [0], [1], [0, 0, 1, 1], [], []>} : vector<49x32xf32>, vector<32x32xf32>, vector<49x32xf32> -> vector<49x32xf32>
    %41 = arith.addf %36, %40 : vector<49x32xf32>
    %42 = vector.extract_strided_slice %12 {offsets = [336, 0], sizes = [49, 32], strides = [1, 1]} : vector<504x32xf32> to vector<49x32xf32>
    %c6 = arith.constant 6 : index
    %c0_29 = arith.constant 0 : index
    %c0_30 = arith.constant 0 : index
    %43 = vector.load %arg7[%c6, %c0_29, %c0_30] : memref<9x32x32xf32, #tpu.memory_space<vmem>>, vector<1x32x32xf32>
    %44 = vector.shape_cast %43 : vector<1x32x32xf32> to vector<32x32xf32>
    %cst_31 = arith.constant dense<0.000000e+00> : vector<49x32xf32>
    %45 = tpu.matmul %42, %44, %cst_31 {dimension_numbers = #tpu.dot_dimension_numbers<[1], [0], [0], [1], [0, 0, 1, 1], [], []>} : vector<49x32xf32>, vector<32x32xf32>, vector<49x32xf32> -> vector<49x32xf32>
    %46 = arith.addf %41, %45 : vector<49x32xf32>
    %47 = vector.extract_strided_slice %12 {offsets = [392, 0], sizes = [49, 32], strides = [1, 1]} : vector<504x32xf32> to vector<49x32xf32>
    %c7 = arith.constant 7 : index
    %c0_32 = arith.constant 0 : index
    %c0_33 = arith.constant 0 : index
    %48 = vector.load %arg7[%c7, %c0_32, %c0_33] : memref<9x32x32xf32, #tpu.memory_space<vmem>>, vector<1x32x32xf32>
    %49 = vector.shape_cast %48 : vector<1x32x32xf32> to vector<32x32xf32>
    %cst_34 = arith.constant dense<0.000000e+00> : vector<49x32xf32>
    %50 = tpu.matmul %47, %49, %cst_34 {dimension_numbers = #tpu.dot_dimension_numbers<[1], [0], [0], [1], [0, 0, 1, 1], [], []>} : vector<49x32xf32>, vector<32x32xf32>, vector<49x32xf32> -> vector<49x32xf32>
    %51 = arith.addf %46, %50 : vector<49x32xf32>
    %52 = vector.extract_strided_slice %12 {offsets = [448, 0], sizes = [49, 32], strides = [1, 1]} : vector<504x32xf32> to vector<49x32xf32>
    %c8 = arith.constant 8 : index
    %c0_35 = arith.constant 0 : index
    %c0_36 = arith.constant 0 : index
    %53 = vector.load %arg7[%c8, %c0_35, %c0_36] : memref<9x32x32xf32, #tpu.memory_space<vmem>>, vector<1x32x32xf32>
    %54 = vector.shape_cast %53 : vector<1x32x32xf32> to vector<32x32xf32>
    %cst_37 = arith.constant dense<0.000000e+00> : vector<49x32xf32>
    %55 = tpu.matmul %52, %54, %cst_37 {dimension_numbers = #tpu.dot_dimension_numbers<[1], [0], [0], [1], [0, 0, 1, 1], [], []>} : vector<49x32xf32>, vector<32x32xf32>, vector<49x32xf32> -> vector<49x32xf32>
    %56 = arith.addf %51, %55 : vector<49x32xf32>
    %c0_38 = arith.constant 0 : index
    %c0_39 = arith.constant 0 : index
    %57 = vector.load %arg8[%c0_38, %c0_39] : memref<1x32xf32, #tpu.memory_space<vmem>>, vector<1x32xf32>
    %58 = vector.broadcast %57 : vector<1x32xf32> to vector<49x32xf32>
    %59 = arith.addf %56, %58 : vector<49x32xf32>
    %60 = math.tanh %59 : vector<49x32xf32>
    %c0_40 = arith.constant 0 : index
    %c0_41 = arith.constant 0 : index
    %61 = vector.load %arg9[%c0_40, %c0_41] : memref<144x49xf32, #tpu.memory_space<vmem>>, vector<144x49xf32>
    %cst_42 = arith.constant dense<0.000000e+00> : vector<144x32xf32>
    %62 = tpu.matmul %61, %60, %cst_42 {dimension_numbers = #tpu.dot_dimension_numbers<[1], [0], [0], [1], [0, 0, 1, 1], [], []>} : vector<144x49xf32>, vector<49x32xf32>, vector<144x32xf32> -> vector<144x32xf32>
    %63 = vector.extract_strided_slice %62 {offsets = [0, 0], sizes = [9, 32], strides = [1, 1]} : vector<144x32xf32> to vector<9x32xf32>
    %c0_43 = arith.constant 0 : index
    %c0_44 = arith.constant 0 : index
    %c0_45 = arith.constant 0 : index
    %64 = vector.load %arg10[%c0_43, %c0_44, %c0_45] : memref<9x32x32xf32, #tpu.memory_space<vmem>>, vector<1x32x32xf32>
    %65 = vector.shape_cast %64 : vector<1x32x32xf32> to vector<32x32xf32>
    %cst_46 = arith.constant dense<0.000000e+00> : vector<9x32xf32>
    %66 = tpu.matmul %63, %65, %cst_46 {dimension_numbers = #tpu.dot_dimension_numbers<[1], [0], [0], [1], [0, 0, 1, 1], [], []>} : vector<9x32xf32>, vector<32x32xf32>, vector<9x32xf32> -> vector<9x32xf32>
    %67 = vector.extract_strided_slice %62 {offsets = [16, 0], sizes = [9, 32], strides = [1, 1]} : vector<144x32xf32> to vector<9x32xf32>
    %c1_47 = arith.constant 1 : index
    %c0_48 = arith.constant 0 : index
    %c0_49 = arith.constant 0 : index
    %68 = vector.load %arg10[%c1_47, %c0_48, %c0_49] : memref<9x32x32xf32, #tpu.memory_space<vmem>>, vector<1x32x32xf32>
    %69 = vector.shape_cast %68 : vector<1x32x32xf32> to vector<32x32xf32>
    %cst_50 = arith.constant dense<0.000000e+00> : vector<9x32xf32>
    %70 = tpu.matmul %67, %69, %cst_50 {dimension_numbers = #tpu.dot_dimension_numbers<[1], [0], [0], [1], [0, 0, 1, 1], [], []>} : vector<9x32xf32>, vector<32x32xf32>, vector<9x32xf32> -> vector<9x32xf32>
    %71 = arith.addf %66, %70 : vector<9x32xf32>
    %72 = vector.extract_strided_slice %62 {offsets = [32, 0], sizes = [9, 32], strides = [1, 1]} : vector<144x32xf32> to vector<9x32xf32>
    %c2_51 = arith.constant 2 : index
    %c0_52 = arith.constant 0 : index
    %c0_53 = arith.constant 0 : index
    %73 = vector.load %arg10[%c2_51, %c0_52, %c0_53] : memref<9x32x32xf32, #tpu.memory_space<vmem>>, vector<1x32x32xf32>
    %74 = vector.shape_cast %73 : vector<1x32x32xf32> to vector<32x32xf32>
    %cst_54 = arith.constant dense<0.000000e+00> : vector<9x32xf32>
    %75 = tpu.matmul %72, %74, %cst_54 {dimension_numbers = #tpu.dot_dimension_numbers<[1], [0], [0], [1], [0, 0, 1, 1], [], []>} : vector<9x32xf32>, vector<32x32xf32>, vector<9x32xf32> -> vector<9x32xf32>
    %76 = arith.addf %71, %75 : vector<9x32xf32>
    %77 = vector.extract_strided_slice %62 {offsets = [48, 0], sizes = [9, 32], strides = [1, 1]} : vector<144x32xf32> to vector<9x32xf32>
    %c3_55 = arith.constant 3 : index
    %c0_56 = arith.constant 0 : index
    %c0_57 = arith.constant 0 : index
    %78 = vector.load %arg10[%c3_55, %c0_56, %c0_57] : memref<9x32x32xf32, #tpu.memory_space<vmem>>, vector<1x32x32xf32>
    %79 = vector.shape_cast %78 : vector<1x32x32xf32> to vector<32x32xf32>
    %cst_58 = arith.constant dense<0.000000e+00> : vector<9x32xf32>
    %80 = tpu.matmul %77, %79, %cst_58 {dimension_numbers = #tpu.dot_dimension_numbers<[1], [0], [0], [1], [0, 0, 1, 1], [], []>} : vector<9x32xf32>, vector<32x32xf32>, vector<9x32xf32> -> vector<9x32xf32>
    %81 = arith.addf %76, %80 : vector<9x32xf32>
    %82 = vector.extract_strided_slice %62 {offsets = [64, 0], sizes = [9, 32], strides = [1, 1]} : vector<144x32xf32> to vector<9x32xf32>
    %c4_59 = arith.constant 4 : index
    %c0_60 = arith.constant 0 : index
    %c0_61 = arith.constant 0 : index
    %83 = vector.load %arg10[%c4_59, %c0_60, %c0_61] : memref<9x32x32xf32, #tpu.memory_space<vmem>>, vector<1x32x32xf32>
    %84 = vector.shape_cast %83 : vector<1x32x32xf32> to vector<32x32xf32>
    %cst_62 = arith.constant dense<0.000000e+00> : vector<9x32xf32>
    %85 = tpu.matmul %82, %84, %cst_62 {dimension_numbers = #tpu.dot_dimension_numbers<[1], [0], [0], [1], [0, 0, 1, 1], [], []>} : vector<9x32xf32>, vector<32x32xf32>, vector<9x32xf32> -> vector<9x32xf32>
    %86 = arith.addf %81, %85 : vector<9x32xf32>
    %87 = vector.extract_strided_slice %62 {offsets = [80, 0], sizes = [9, 32], strides = [1, 1]} : vector<144x32xf32> to vector<9x32xf32>
    %c5_63 = arith.constant 5 : index
    %c0_64 = arith.constant 0 : index
    %c0_65 = arith.constant 0 : index
    %88 = vector.load %arg10[%c5_63, %c0_64, %c0_65] : memref<9x32x32xf32, #tpu.memory_space<vmem>>, vector<1x32x32xf32>
    %89 = vector.shape_cast %88 : vector<1x32x32xf32> to vector<32x32xf32>
    %cst_66 = arith.constant dense<0.000000e+00> : vector<9x32xf32>
    %90 = tpu.matmul %87, %89, %cst_66 {dimension_numbers = #tpu.dot_dimension_numbers<[1], [0], [0], [1], [0, 0, 1, 1], [], []>} : vector<9x32xf32>, vector<32x32xf32>, vector<9x32xf32> -> vector<9x32xf32>
    %91 = arith.addf %86, %90 : vector<9x32xf32>
    %92 = vector.extract_strided_slice %62 {offsets = [96, 0], sizes = [9, 32], strides = [1, 1]} : vector<144x32xf32> to vector<9x32xf32>
    %c6_67 = arith.constant 6 : index
    %c0_68 = arith.constant 0 : index
    %c0_69 = arith.constant 0 : index
    %93 = vector.load %arg10[%c6_67, %c0_68, %c0_69] : memref<9x32x32xf32, #tpu.memory_space<vmem>>, vector<1x32x32xf32>
    %94 = vector.shape_cast %93 : vector<1x32x32xf32> to vector<32x32xf32>
    %cst_70 = arith.constant dense<0.000000e+00> : vector<9x32xf32>
    %95 = tpu.matmul %92, %94, %cst_70 {dimension_numbers = #tpu.dot_dimension_numbers<[1], [0], [0], [1], [0, 0, 1, 1], [], []>} : vector<9x32xf32>, vector<32x32xf32>, vector<9x32xf32> -> vector<9x32xf32>
    %96 = arith.addf %91, %95 : vector<9x32xf32>
    %97 = vector.extract_strided_slice %62 {offsets = [112, 0], sizes = [9, 32], strides = [1, 1]} : vector<144x32xf32> to vector<9x32xf32>
    %c7_71 = arith.constant 7 : index
    %c0_72 = arith.constant 0 : index
    %c0_73 = arith.constant 0 : index
    %98 = vector.load %arg10[%c7_71, %c0_72, %c0_73] : memref<9x32x32xf32, #tpu.memory_space<vmem>>, vector<1x32x32xf32>
    %99 = vector.shape_cast %98 : vector<1x32x32xf32> to vector<32x32xf32>
    %cst_74 = arith.constant dense<0.000000e+00> : vector<9x32xf32>
    %100 = tpu.matmul %97, %99, %cst_74 {dimension_numbers = #tpu.dot_dimension_numbers<[1], [0], [0], [1], [0, 0, 1, 1], [], []>} : vector<9x32xf32>, vector<32x32xf32>, vector<9x32xf32> -> vector<9x32xf32>
    %101 = arith.addf %96, %100 : vector<9x32xf32>
    %102 = vector.extract_strided_slice %62 {offsets = [128, 0], sizes = [9, 32], strides = [1, 1]} : vector<144x32xf32> to vector<9x32xf32>
    %c8_75 = arith.constant 8 : index
    %c0_76 = arith.constant 0 : index
    %c0_77 = arith.constant 0 : index
    %103 = vector.load %arg10[%c8_75, %c0_76, %c0_77] : memref<9x32x32xf32, #tpu.memory_space<vmem>>, vector<1x32x32xf32>
    %104 = vector.shape_cast %103 : vector<1x32x32xf32> to vector<32x32xf32>
    %cst_78 = arith.constant dense<0.000000e+00> : vector<9x32xf32>
    %105 = tpu.matmul %102, %104, %cst_78 {dimension_numbers = #tpu.dot_dimension_numbers<[1], [0], [0], [1], [0, 0, 1, 1], [], []>} : vector<9x32xf32>, vector<32x32xf32>, vector<9x32xf32> -> vector<9x32xf32>
    %106 = arith.addf %101, %105 : vector<9x32xf32>
    %c0_79 = arith.constant 0 : index
    %c0_80 = arith.constant 0 : index
    %107 = vector.load %arg11[%c0_79, %c0_80] : memref<1x32xf32, #tpu.memory_space<vmem>>, vector<1x32xf32>
    %108 = vector.broadcast %107 : vector<1x32xf32> to vector<9x32xf32>
    %109 = arith.addf %106, %108 : vector<9x32xf32>
    %110 = math.tanh %109 : vector<9x32xf32>
    %111 = vector.extract_strided_slice %110 {offsets = [0, 0], sizes = [1, 32], strides = [1, 1]} : vector<9x32xf32> to vector<1x32xf32>
    %c0_81 = arith.constant 0 : index
    %c0_82 = arith.constant 0 : index
    %c0_83 = arith.constant 0 : index
    %112 = vector.load %arg12[%c0_81, %c0_82, %c0_83] : memref<9x32x32xf32, #tpu.memory_space<vmem>>, vector<1x32x32xf32>
    %113 = vector.shape_cast %112 : vector<1x32x32xf32> to vector<32x32xf32>
    %cst_84 = arith.constant dense<0.000000e+00> : vector<1x32xf32>
    %114 = tpu.matmul %111, %113, %cst_84 {dimension_numbers = #tpu.dot_dimension_numbers<[1], [0], [0], [1], [0, 0, 1, 1], [], []>} : vector<1x32xf32>, vector<32x32xf32>, vector<1x32xf32> -> vector<1x32xf32>
    %115 = vector.extract_strided_slice %110 {offsets = [1, 0], sizes = [1, 32], strides = [1, 1]} : vector<9x32xf32> to vector<1x32xf32>
    %c1_85 = arith.constant 1 : index
    %c0_86 = arith.constant 0 : index
    %c0_87 = arith.constant 0 : index
    %116 = vector.load %arg12[%c1_85, %c0_86, %c0_87] : memref<9x32x32xf32, #tpu.memory_space<vmem>>, vector<1x32x32xf32>
    %117 = vector.shape_cast %116 : vector<1x32x32xf32> to vector<32x32xf32>
    %cst_88 = arith.constant dense<0.000000e+00> : vector<1x32xf32>
    %118 = tpu.matmul %115, %117, %cst_88 {dimension_numbers = #tpu.dot_dimension_numbers<[1], [0], [0], [1], [0, 0, 1, 1], [], []>} : vector<1x32xf32>, vector<32x32xf32>, vector<1x32xf32> -> vector<1x32xf32>
    %119 = arith.addf %114, %118 : vector<1x32xf32>
    %120 = vector.extract_strided_slice %110 {offsets = [2, 0], sizes = [1, 32], strides = [1, 1]} : vector<9x32xf32> to vector<1x32xf32>
    %c2_89 = arith.constant 2 : index
    %c0_90 = arith.constant 0 : index
    %c0_91 = arith.constant 0 : index
    %121 = vector.load %arg12[%c2_89, %c0_90, %c0_91] : memref<9x32x32xf32, #tpu.memory_space<vmem>>, vector<1x32x32xf32>
    %122 = vector.shape_cast %121 : vector<1x32x32xf32> to vector<32x32xf32>
    %cst_92 = arith.constant dense<0.000000e+00> : vector<1x32xf32>
    %123 = tpu.matmul %120, %122, %cst_92 {dimension_numbers = #tpu.dot_dimension_numbers<[1], [0], [0], [1], [0, 0, 1, 1], [], []>} : vector<1x32xf32>, vector<32x32xf32>, vector<1x32xf32> -> vector<1x32xf32>
    %124 = arith.addf %119, %123 : vector<1x32xf32>
    %125 = vector.extract_strided_slice %110 {offsets = [3, 0], sizes = [1, 32], strides = [1, 1]} : vector<9x32xf32> to vector<1x32xf32>
    %c3_93 = arith.constant 3 : index
    %c0_94 = arith.constant 0 : index
    %c0_95 = arith.constant 0 : index
    %126 = vector.load %arg12[%c3_93, %c0_94, %c0_95] : memref<9x32x32xf32, #tpu.memory_space<vmem>>, vector<1x32x32xf32>
    %127 = vector.shape_cast %126 : vector<1x32x32xf32> to vector<32x32xf32>
    %cst_96 = arith.constant dense<0.000000e+00> : vector<1x32xf32>
    %128 = tpu.matmul %125, %127, %cst_96 {dimension_numbers = #tpu.dot_dimension_numbers<[1], [0], [0], [1], [0, 0, 1, 1], [], []>} : vector<1x32xf32>, vector<32x32xf32>, vector<1x32xf32> -> vector<1x32xf32>
    %129 = arith.addf %124, %128 : vector<1x32xf32>
    %130 = vector.extract_strided_slice %110 {offsets = [4, 0], sizes = [1, 32], strides = [1, 1]} : vector<9x32xf32> to vector<1x32xf32>
    %c4_97 = arith.constant 4 : index
    %c0_98 = arith.constant 0 : index
    %c0_99 = arith.constant 0 : index
    %131 = vector.load %arg12[%c4_97, %c0_98, %c0_99] : memref<9x32x32xf32, #tpu.memory_space<vmem>>, vector<1x32x32xf32>
    %132 = vector.shape_cast %131 : vector<1x32x32xf32> to vector<32x32xf32>
    %cst_100 = arith.constant dense<0.000000e+00> : vector<1x32xf32>
    %133 = tpu.matmul %130, %132, %cst_100 {dimension_numbers = #tpu.dot_dimension_numbers<[1], [0], [0], [1], [0, 0, 1, 1], [], []>} : vector<1x32xf32>, vector<32x32xf32>, vector<1x32xf32> -> vector<1x32xf32>
    %134 = arith.addf %129, %133 : vector<1x32xf32>
    %135 = vector.extract_strided_slice %110 {offsets = [5, 0], sizes = [1, 32], strides = [1, 1]} : vector<9x32xf32> to vector<1x32xf32>
    %c5_101 = arith.constant 5 : index
    %c0_102 = arith.constant 0 : index
    %c0_103 = arith.constant 0 : index
    %136 = vector.load %arg12[%c5_101, %c0_102, %c0_103] : memref<9x32x32xf32, #tpu.memory_space<vmem>>, vector<1x32x32xf32>
    %137 = vector.shape_cast %136 : vector<1x32x32xf32> to vector<32x32xf32>
    %cst_104 = arith.constant dense<0.000000e+00> : vector<1x32xf32>
    %138 = tpu.matmul %135, %137, %cst_104 {dimension_numbers = #tpu.dot_dimension_numbers<[1], [0], [0], [1], [0, 0, 1, 1], [], []>} : vector<1x32xf32>, vector<32x32xf32>, vector<1x32xf32> -> vector<1x32xf32>
    %139 = arith.addf %134, %138 : vector<1x32xf32>
    %140 = vector.extract_strided_slice %110 {offsets = [6, 0], sizes = [1, 32], strides = [1, 1]} : vector<9x32xf32> to vector<1x32xf32>
    %c6_105 = arith.constant 6 : index
    %c0_106 = arith.constant 0 : index
    %c0_107 = arith.constant 0 : index
    %141 = vector.load %arg12[%c6_105, %c0_106, %c0_107] : memref<9x32x32xf32, #tpu.memory_space<vmem>>, vector<1x32x32xf32>
    %142 = vector.shape_cast %141 : vector<1x32x32xf32> to vector<32x32xf32>
    %cst_108 = arith.constant dense<0.000000e+00> : vector<1x32xf32>
    %143 = tpu.matmul %140, %142, %cst_108 {dimension_numbers = #tpu.dot_dimension_numbers<[1], [0], [0], [1], [0, 0, 1, 1], [], []>} : vector<1x32xf32>, vector<32x32xf32>, vector<1x32xf32> -> vector<1x32xf32>
    %144 = arith.addf %139, %143 : vector<1x32xf32>
    %145 = vector.extract_strided_slice %110 {offsets = [7, 0], sizes = [1, 32], strides = [1, 1]} : vector<9x32xf32> to vector<1x32xf32>
    %c7_109 = arith.constant 7 : index
    %c0_110 = arith.constant 0 : index
    %c0_111 = arith.constant 0 : index
    %146 = vector.load %arg12[%c7_109, %c0_110, %c0_111] : memref<9x32x32xf32, #tpu.memory_space<vmem>>, vector<1x32x32xf32>
    %147 = vector.shape_cast %146 : vector<1x32x32xf32> to vector<32x32xf32>
    %cst_112 = arith.constant dense<0.000000e+00> : vector<1x32xf32>
    %148 = tpu.matmul %145, %147, %cst_112 {dimension_numbers = #tpu.dot_dimension_numbers<[1], [0], [0], [1], [0, 0, 1, 1], [], []>} : vector<1x32xf32>, vector<32x32xf32>, vector<1x32xf32> -> vector<1x32xf32>
    %149 = arith.addf %144, %148 : vector<1x32xf32>
    %150 = vector.extract_strided_slice %110 {offsets = [8, 0], sizes = [1, 32], strides = [1, 1]} : vector<9x32xf32> to vector<1x32xf32>
    %c8_113 = arith.constant 8 : index
    %c0_114 = arith.constant 0 : index
    %c0_115 = arith.constant 0 : index
    %151 = vector.load %arg12[%c8_113, %c0_114, %c0_115] : memref<9x32x32xf32, #tpu.memory_space<vmem>>, vector<1x32x32xf32>
    %152 = vector.shape_cast %151 : vector<1x32x32xf32> to vector<32x32xf32>
    %cst_116 = arith.constant dense<0.000000e+00> : vector<1x32xf32>
    %153 = tpu.matmul %150, %152, %cst_116 {dimension_numbers = #tpu.dot_dimension_numbers<[1], [0], [0], [1], [0, 0, 1, 1], [], []>} : vector<1x32xf32>, vector<32x32xf32>, vector<1x32xf32> -> vector<1x32xf32>
    %154 = arith.addf %149, %153 : vector<1x32xf32>
    %c0_117 = arith.constant 0 : index
    %c0_118 = arith.constant 0 : index
    %155 = vector.load %arg13[%c0_117, %c0_118] : memref<1x32xf32, #tpu.memory_space<vmem>>, vector<1x32xf32>
    %156 = arith.addf %154, %155 : vector<1x32xf32>
    %157 = math.tanh %156 : vector<1x32xf32>
    %c0_119 = arith.constant 0 : index
    %c0_120 = arith.constant 0 : index
    %158 = vector.load %arg20[%c0_119, %c0_120] : memref<32x5xf32, #tpu.memory_space<vmem>>, vector<32x5xf32>
    %c0_121 = arith.constant 0 : index
    %c0_122 = arith.constant 0 : index
    %159 = vector.load %arg14[%c0_121, %c0_122] : memref<32x5xf32, #tpu.memory_space<vmem>>, vector<32x5xf32>
    %c0_123 = arith.constant 0 : index
    %c0_124 = arith.constant 0 : index
    %160 = vector.load %arg15[%c0_123, %c0_124] : memref<32x5xf32, #tpu.memory_space<vmem>>, vector<32x5xf32>
    %161 = arith.mulf %160, %158 : vector<32x5xf32>
    %162 = arith.addf %159, %161 : vector<32x5xf32>
    %cst_125 = arith.constant dense<0.000000e+00> : vector<1x5xf32>
    %163 = tpu.matmul %157, %162, %cst_125 {dimension_numbers = #tpu.dot_dimension_numbers<[1], [0], [0], [1], [0, 0, 1, 1], [], []>} : vector<1x32xf32>, vector<32x5xf32>, vector<1x5xf32> -> vector<1x5xf32>
    %c0_126 = arith.constant 0 : index
    %c0_127 = arith.constant 0 : index
    %c0_128 = arith.constant 0 : index
    %164 = vector.load %arg3[%c0_126, %c0_127, %c0_128] : memref<1x1x5xf32, #tpu.memory_space<vmem>>, vector<1x1x5xf32>
    %165 = vector.shape_cast %164 : vector<1x1x5xf32> to vector<1x5xf32>
    %cst_129 = arith.constant 1.000000e+03 : f32
    %166 = vector.broadcast %cst_129 : f32 to vector<1x5xf32>
    %167 = arith.mulf %166, %165 : vector<1x5xf32>
    %168 = arith.addf %163, %167 : vector<1x5xf32>
    %cst_130 = arith.constant dense<0xFF800000> : vector<1xf32>
    %169 = vector.multi_reduction <maximumf>, %168, %cst_130 [1] : vector<1x5xf32> to vector<1xf32>
    %170 = vector.shape_cast %169 : vector<1xf32> to vector<1x1xf32>
    %171 = vector.broadcast %170 : vector<1x1xf32> to vector<1x5xf32>
    %172 = arith.subf %168, %171 : vector<1x5xf32>
    %173 = math.exp %172 : vector<1x5xf32>
    %cst_131 = arith.constant dense<0.000000e+00> : vector<1xf32>
    %174 = vector.multi_reduction <add>, %173, %cst_131 [1] : vector<1x5xf32> to vector<1xf32>
    %175 = vector.shape_cast %174 : vector<1xf32> to vector<1x1xf32>
    %176 = tpu.reciprocal %175 {approx = true} : vector<1x1xf32> -> vector<1x1xf32>
    %177 = vector.broadcast %176 : vector<1x1xf32> to vector<1x5xf32>
    %178 = arith.mulf %173, %177 : vector<1x5xf32>
    %c0_132 = arith.constant 0 : index
    %c0_133 = arith.constant 0 : index
    %c0_134 = arith.constant 0 : index
    %179 = vector.load %arg18[%c0_132, %c0_133, %c0_134] : memref<1x1x5xf32, #tpu.memory_space<vmem>>, vector<1x1x5xf32>
    %180 = vector.shape_cast %179 : vector<1x1x5xf32> to vector<1x5xf32>
    %181 = vector.shape_cast %178 : vector<1x5xf32> to vector<1x1x5xf32>
    tpu.vector_store %arg18[%c0_132, %c0_133, %c0_134], %181 {strides = array<i32>} : memref<1x1x5xf32, #tpu.memory_space<vmem>>, vector<1x1x5xf32>,
    %c0_135 = arith.constant 0 : index
    %c0_136 = arith.constant 0 : index
    %182 = vector.load %arg16[%c0_135, %c0_136] : memref<32x32xf32, #tpu.memory_space<vmem>>, vector<32x32xf32>
    %183 = vector.broadcast %157 : vector<1x32xf32> to vector<32x32xf32>
    %184 = arith.mulf %182, %183 : vector<32x32xf32>
    %cst_137 = arith.constant 1.000000e+00 : f32
    %185 = vector.broadcast %cst_137 : f32 to vector<32x5xf32>
    %cst_138 = arith.constant dense<0.000000e+00> : vector<32x5xf32>
    %186 = tpu.matmul %184, %185, %cst_138 {dimension_numbers = #tpu.dot_dimension_numbers<[1], [0], [0], [1], [0, 0, 1, 1], [], []>} : vector<32x32xf32>, vector<32x5xf32>, vector<32x5xf32> -> vector<32x5xf32>
    %187 = vector.broadcast %178 : vector<1x5xf32> to vector<32x5xf32>
    %188 = arith.mulf %186, %187 : vector<32x5xf32>
    %c0_139 = arith.constant 0 : index
    %189 = memref.load %arg1[%c0_139] : memref<1xf32, #tpu.memory_space<smem>>
    %cst_140 = arith.constant 1.000000e+00 : f32
    %190 = arith.subf %cst_140, %189 : f32
    %191 = vector.broadcast %190 : f32 to vector<32x5xf32>
    %192 = arith.mulf %191, %158 : vector<32x5xf32>
    %193 = vector.broadcast %189 : f32 to vector<32x5xf32>
    %194 = arith.mulf %193, %188 : vector<32x5xf32>
    %195 = arith.addf %192, %194 : vector<32x5xf32>
    %c0_141 = arith.constant 0 : index
    %c0_142 = arith.constant 0 : index
    %196 = vector.load %arg20[%c0_141, %c0_142] : memref<32x5xf32, #tpu.memory_space<vmem>>, vector<32x5xf32>
    tpu.vector_store %arg20[%c0_141, %c0_142], %195 {strides = array<i32>} : memref<32x5xf32, #tpu.memory_space<vmem>>, vector<32x5xf32>,
    %c0_143 = arith.constant 0 : index
    %c0_144 = arith.constant 0 : index
    %197 = vector.load %arg19[%c0_143, %c0_144] : memref<32x5xf32, #tpu.memory_space<vmem>>, vector<32x5xf32>
    tpu.vector_store %arg19[%c0_143, %c0_144], %195 {strides = array<i32>} : memref<32x5xf32, #tpu.memory_space<vmem>>, vector<32x5xf32>,
    return
  }
  func.func @transform_0(%arg0: i32) -> i32 {
    %c0_i32 = arith.constant 0 : i32
    %c0_i32_0 = arith.constant 0 : i32
    return %c0_i32 : i32
  }
  func.func @transform_1(%arg0: i32) -> (i32, i32, i32) {
    %c0_i32 = arith.constant 0 : i32
    %c0_i32_0 = arith.constant 0 : i32
    %c0_i32_1 = arith.constant 0 : i32
    return %arg0, %c0_i32, %c0_i32_0 : i32, i32, i32
  }
  func.func @transform_2(%arg0: i32) -> (i32, i32, i32) {
    %c0_i32 = arith.constant 0 : i32
    %c0_i32_0 = arith.constant 0 : i32
    %c0_i32_1 = arith.constant 0 : i32
    return %arg0, %c0_i32, %c0_i32_0 : i32, i32, i32
  }
  func.func @transform_3(%arg0: i32) -> (i32, i32) {
    %c0_i32 = arith.constant 0 : i32
    %c0_i32_0 = arith.constant 0 : i32
    %c0_i32_1 = arith.constant 0 : i32
    return %c0_i32, %c0_i32_0 : i32, i32
  }
  func.func @transform_4(%arg0: i32) -> (i32, i32) {
    %c0_i32 = arith.constant 0 : i32
    %c0_i32_0 = arith.constant 0 : i32
    %c0_i32_1 = arith.constant 0 : i32
    return %c0_i32, %c0_i32_0 : i32, i32
  }
  func.func @transform_5(%arg0: i32) -> (i32, i32) {
    %c0_i32 = arith.constant 0 : i32
    %c0_i32_0 = arith.constant 0 : i32
    %c0_i32_1 = arith.constant 0 : i32
    return %c0_i32, %c0_i32_0 : i32, i32
  }
  func.func @transform_6(%arg0: i32) -> (i32, i32, i32) {
    %c0_i32 = arith.constant 0 : i32
    %c0_i32_0 = arith.constant 0 : i32
    %c0_i32_1 = arith.constant 0 : i32
    %c0_i32_2 = arith.constant 0 : i32
    return %c0_i32, %c0_i32_0, %c0_i32_1 : i32, i32, i32
  }
  func.func @transform_7(%arg0: i32) -> (i32, i32) {
    %c0_i32 = arith.constant 0 : i32
    %c0_i32_0 = arith.constant 0 : i32
    %c0_i32_1 = arith.constant 0 : i32
    return %c0_i32, %c0_i32_0 : i32, i32
  }
  func.func @transform_8(%arg0: i32) -> (i32, i32) {
    %c0_i32 = arith.constant 0 : i32
    %c0_i32_0 = arith.constant 0 : i32
    %c0_i32_1 = arith.constant 0 : i32
    return %c0_i32, %c0_i32_0 : i32, i32
  }
  func.func @transform_9(%arg0: i32) -> (i32, i32, i32) {
    %c0_i32 = arith.constant 0 : i32
    %c0_i32_0 = arith.constant 0 : i32
    %c0_i32_1 = arith.constant 0 : i32
    %c0_i32_2 = arith.constant 0 : i32
    return %c0_i32, %c0_i32_0, %c0_i32_1 : i32, i32, i32
  }
  func.func @transform_10(%arg0: i32) -> (i32, i32) {
    %c0_i32 = arith.constant 0 : i32
    %c0_i32_0 = arith.constant 0 : i32
    %c0_i32_1 = arith.constant 0 : i32
    return %c0_i32, %c0_i32_0 : i32, i32
  }
  func.func @transform_11(%arg0: i32) -> (i32, i32, i32) {
    %c0_i32 = arith.constant 0 : i32
    %c0_i32_0 = arith.constant 0 : i32
    %c0_i32_1 = arith.constant 0 : i32
    %c0_i32_2 = arith.constant 0 : i32
    return %c0_i32, %c0_i32_0, %c0_i32_1 : i32, i32, i32
  }
  func.func @transform_12(%arg0: i32) -> (i32, i32) {
    %c0_i32 = arith.constant 0 : i32
    %c0_i32_0 = arith.constant 0 : i32
    %c0_i32_1 = arith.constant 0 : i32
    return %c0_i32, %c0_i32_0 : i32, i32
  }
  func.func @transform_13(%arg0: i32) -> (i32, i32) {
    %c0_i32 = arith.constant 0 : i32
    %c0_i32_0 = arith.constant 0 : i32
    %c0_i32_1 = arith.constant 0 : i32
    return %c0_i32, %c0_i32_0 : i32, i32
  }
  func.func @transform_14(%arg0: i32) -> (i32, i32) {
    %c0_i32 = arith.constant 0 : i32
    %c0_i32_0 = arith.constant 0 : i32
    %c0_i32_1 = arith.constant 0 : i32
    return %c0_i32, %c0_i32_0 : i32, i32
  }
  func.func @transform_15(%arg0: i32) -> (i32, i32) {
    %c0_i32 = arith.constant 0 : i32
    %c0_i32_0 = arith.constant 0 : i32
    %c0_i32_1 = arith.constant 0 : i32
    return %c0_i32, %c0_i32_0 : i32, i32
  }
  func.func @transform_16(%arg0: i32) -> (i32, i32) {
    %c0_i32 = arith.constant 0 : i32
    %c0_i32_0 = arith.constant 0 : i32
    %c0_i32_1 = arith.constant 0 : i32
    return %c0_i32, %c0_i32_0 : i32, i32
  }
  func.func @transform_17(%arg0: i32) -> (i32, i32, i32) {
    %c0_i32 = arith.constant 0 : i32
    %c0_i32_0 = arith.constant 0 : i32
    %c0_i32_1 = arith.constant 0 : i32
    return %arg0, %c0_i32, %c0_i32_0 : i32, i32, i32
  }
  func.func @transform_18(%arg0: i32) -> (i32, i32) {
    %c0_i32 = arith.constant 0 : i32
    %c0_i32_0 = arith.constant 0 : i32
    %c0_i32_1 = arith.constant 0 : i32
    return %c0_i32, %c0_i32_0 : i32, i32
  }
}

</mosaic_0001>

<bundles_post_ra>
// kernel: network_forward_episode.1
= control target key start
LH: loop header
LB: loop body
LE: loop exit
PB: predicated region body
PF: predicated region fallthrough
CT: control target
= control target key end

     0   :  { %s3690_s30 = smov 0   ;;  %s5126_s0 = inlined_call_operand.<no memory space> [shape: f32[1], index: 0, kind: input, shape index: {}]   ;;  %s5127_s1 = inlined_call_operand.vmem [shape: f32[8,225,9], index: 1, kind: input, shape index: {}]   ;;  %s5128_s2 = inlined_call_operand.vmem [shape: f32[8,1,5], index: 2, kind: input, shape index: {}]   ;;  %s5129_s3 = inlined_call_operand.vmem [shape: f32[9,32], index: 3, kind: input, shape index: {}]   ;;  %s5130_s4 = inlined_call_operand.vmem [shape: f32[1,32], index: 4, kind: input, shape index: {}]   ;;  %s5131_s5 = inlined_call_operand.vmem [shape: f32[504,225], index: 5, kind: input, shape index: {}]   ;;  %s5132_s6 = inlined_call_operand.vmem [shape: f32[9,32,32], index: 6, kind: input, shape index: {}]   ;;  %s5133_s7 = inlined_call_operand.vmem [shape: f32[1,32], index: 7, kind: input, shape index: {}]   ;;  %s5134_s8 = inlined_call_operand.vmem [shape: f32[144,49], index: 8, kind: input, shape index: {}]   ;;  %s5135_s9 = inlined_call_operand.vmem [shape: f32[9,32,32], index: 9, kind: input, shape index: {}]   ;;  %s5136_s10 = inlined_call_operand.vmem [shape: f32[1,32], index: 10, kind: input, shape index: {}]   ;;  %s5137_s11 = inlined_call_operand.vmem [shape: f32[9,32,32], index: 11, kind: input, shape index: {}]   ;;  %s5138_s12 = inlined_call_operand.vmem [shape: f32[1,32], index: 12, kind: input, shape index: {}]   ;;  %s5139_s13 = inlined_call_operand.vmem [shape: f32[32,5], index: 13, kind: input, shape index: {}]   ;;  %s5140_s14 = inlined_call_operand.vmem [shape: f32[32,5], index: 14, kind: input, shape index: {}]   ;;  %s5141_s15 = inlined_call_operand.vmem [shape: f32[32,32], index: 15, kind: input, shape index: {}]   ;;  %s5142_s16 = inlined_call_operand.vmem [shape: f32[32,5], index: 16, kind: input, shape index: {}, may-alias: {16,18}]   ;;  %s5143_s17 = inlined_call_operand.vmem [shape: f32[8,1,5], index: 17, kind: output, shape index: {0}]   ;;  %s5144_s18 = inlined_call_operand.vmem [shape: f32[32,5], index: 18, kind: output, shape index: {1}, may-alias: {16,18}]  }
   0x1   :  { %5148 = sst [smem:[#allocation5_spill]] %s5126_s0 }
   0x2   :  { %5149 = sst [smem:[#allocation6_spill]] %s5127_s1 }
   0x3   :  { %5150 = sst [smem:[#allocation7_spill]] %s5128_s2 }
   0x4   :  { %5151 = sst [smem:[#allocation8_spill]] %s5138_s12 }
   0x5   :  { %5152 = sst [smem:[#allocation9_spill]] %s5141_s15 }
   0x6   :  { %5153 = sst [smem:[#allocation10_spill]] %s5144_s18 }
   0x7   :  { %s5154_s29 = sld [smem:[#allocation5_spill]] }
   0xd   :  { %24 = sst [smem:[#allocation3]] %s5154_s29 }
   0xe LB: > { %5155 = sst [smem:[#allocation4_spill]] %s3589_s30  ;;  %s3167_s0 = sadd.s32 4294967295, %s3589_s30   ;;  %s3589_s30 = sphi %s3690_s30, %s30_s30  }
   0xf   : > { %p3171_p0 = scmp.ge.s32.totalorder %s3589_s30, 1  ;;  %p519_p1 = scmp.lt.s32.totalorder %s3589_s30, 9 }
  0x11   : > { %p520_p2 = pnand %p3171_p0, %p519_p1 }
  0x12   : > { %p574_p3 = scmp.lt.s32.totalorder (!%p520_p2), %s3167_s0, 7  ;;  %s5156_s22 = sld [smem:[#allocation7_spill]] (!%p520_p2) }
  0x13   : > { %523 = sbr.rel (%p520_p2) target bundleno = 2169 (0x879), region = 88  ;;  %s5157_s28 = sld [smem:[#allocation6_spill]] (!%p520_p2) }
  0x14   : > { %p3173_p4 = scmp.ne.s32.totalorder (!%p520_p2), %s3167_s0, 0 }
  0x18   : > { %s3698_s19 = scalar_select %p574_p3, %s3167_s0, 7 }
  0x19   : > { %588 = sbr.rel (%p3173_p4) target bundleno = 35 (0x23), region = 92 }
  0x1a   : > { %s3488_s1 = smul.u32 232, %s3698_s19  ;;  %s581_s2 = scalar_lea.vmem %s5156_s22, %s3698_s19 }
  0x1b   : > { %s584_s25 = scalar_lea.vmem %s5143_s17, %s3698_s19 }
  0x1c   : > { %s3712_s29 = scalar_lea.vmem %s5157_s28, %s3488_s1 }
  0x1e   : > { %v589_v0 = vld [vmem:[%s5142_s16] sm:$0xff]  ;;  %vm593_vm0 = vcmask 39936   ;;  %v590_v1 = vld [vmem:[%s5142_s16 + $0x8] sm:$0xff]  ;;  %v591_v2 = vld [vmem:[%s5142_s16 + $0x10] sm:$0xff] }
  0x1f   : > { %594 = vst.msk [vmem:[#allocation2] sm:$0xff] %vm593_vm0, %v589_v0  ;;  %v592_v3 = vld [vmem:[%s5142_s16 + $0x18] sm:$0xff] }
  0x20   : > { %595 = vst.msk [vmem:[#allocation2 + $0x8] sm:$0xff] %vm593_vm0, %v590_v1 }
  0x21   : > { %596 = vst.msk [vmem:[#allocation2 + $0x10] sm:$0xff] %vm593_vm0, %v591_v2 }
  0x22   : > { %597 = vst.msk [vmem:[#allocation2 + $0x18] sm:$0xff] %vm593_vm0, %v592_v3 }
  0x23 PF: > { %v628_v4 = vld [vmem:[%s5129_s3 + $0x8] sm:$0x1]  ;;  %vm721_vm1 = vcmask 1040384   ;;  %v627_v5 = vld [vmem:[%s5129_s3] sm:$0xff]  ;;  %vm633_vm2 = vcmask 72704   ;;  %v600_v8 = vld [vmem:[%s3712_s29 + $0x10] sm:$0xff] }
  0x24   : > { %3174 = vmatpush.msk.msra.mxu0 %vm721_vm1, %v628_v4  ;;  %v598_v6 = vld [vmem:[%s3712_s29] sm:$0xff]  ;;  %v599_v7 = vld [vmem:[%s3712_s29 + $0x8] sm:$0xff]  ;;  %v601_v9 = vld [vmem:[%s3712_s29 + $0x18] sm:$0xff]  ;;  %vm984_vm3 = vcmask 793600   ;;  %vm1598_vm4 = vcmask 261120   ;;  %vm2250_vm5 = vcmask 400384  }
  0x25   : > { %v602_v10 = vld [vmem:[%s3712_s29 + $0x20] sm:$0xff]  ;;  %v603_v11 = vld [vmem:[%s3712_s29 + $0x28] sm:$0xff]  ;;  %v604_v12 = vld [vmem:[%s3712_s29 + $0x30] sm:$0xff]  ;;  %s5158_s26 = sld [smem:[#allocation8_spill]]  ;;  %vm3012_vm6 = vcmask 32768   ;;  %vm3096_vm7 = vcmask 39936  }
  0x26   : > { %740 = vmatpush.msra.mxu0 %v627_v5  ;;  %v605_v13 = vld [vmem:[%s3712_s29 + $0x38] sm:$0xff]  ;;  %v606_v14 = vld [vmem:[%s3712_s29 + $0x40] sm:$0xff]  ;;  %v607_v15 = vld [vmem:[%s3712_s29 + $0x48] sm:$0xff]  ;;  %s3080_s1 = sld [smem:[#allocation3]] }
  0x27   : > { %3175 = vmatmul.msk.f32.vlgmr.msra.gmra.mxu0 %vm633_vm2, %v598_v6  ;;  %v608_v16 = vld [vmem:[%s3712_s29 + $0x50] sm:$0xff]  ;;  %v609_v17 = vld [vmem:[%s3712_s29 + $0x58] sm:$0xff]  ;;  %v610_v18 = vld [vmem:[%s3712_s29 + $0x60] sm:$0xff]  ;;  %s5161_s27 = sld [smem:[#allocation10_spill]] }
  0x28   : > { %v611_v19 = vld [vmem:[%s3712_s29 + $0x68] sm:$0xff]  ;;  %v612_v20 = vld [vmem:[%s3712_s29 + $0x70] sm:$0xff]  ;;  %v613_v21 = vld [vmem:[%s3712_s29 + $0x78] sm:$0xff] }
  0x29   : > { %v614_v23 = vld [vmem:[%s3712_s29 + $0x80] sm:$0xff]  ;;  %v615_v25 = vld [vmem:[%s3712_s29 + $0x88] sm:$0xff]  ;;  %v616_v27 = vld [vmem:[%s3712_s29 + $0x90] sm:$0xff] }
  0x2a   : > { %v617_v29 = vld [vmem:[%s3712_s29 + $0x98] sm:$0xff]  ;;  %v618_v31 = vld [vmem:[%s3712_s29 + $0xa0] sm:$0xff]  ;;  %v619_v33 = vld [vmem:[%s3712_s29 + $0xa8] sm:$0xff] }
  0x2b   : > { %v620_v35 = vld [vmem:[%s3712_s29 + $0xb0] sm:$0xff]  ;;  %v621_v37 = vld [vmem:[%s3712_s29 + $0xb8] sm:$0xff]  ;;  %v622_v39 = vld [vmem:[%s3712_s29 + $0xc0] sm:$0xff] }
  0x2c   : > { %v623_v41 = vld [vmem:[%s3712_s29 + $0xc8] sm:$0xff]  ;;  %v624_v43 = vld [vmem:[%s3712_s29 + $0xd0] sm:$0xff]  ;;  %v625_v45 = vld [vmem:[%s3712_s29 + $0xd8] sm:$0xff] }
  0x2d   : > { %v626_v47 = vld [vmem:[%s3712_s29 + $0xe0] sm:$0x1]  ;;  %s5159_s29 = sld [smem:[#allocation9_spill]] }
  0x2e   : > { %v3804_v50 = vld [vmem:[%s5130_s4] ss:$0 sm:$0xff] }
  0x2f   : > { %3176 = vmatmul.msk.f32.gmra.mxu0 %vm633_vm2, %v599_v7 }
  0x37   : > { %3177 = vmatmul.msk.f32.gmra.mxu0 %vm633_vm2, %v600_v8 }
  0x3f   : > { %3178 = vmatmul.msk.f32.gmra.mxu0 %vm633_vm2, %v601_v9 }
  0x47   : > { %3179 = vmatmul.msk.f32.gmra.mxu0 %vm633_vm2, %v602_v10 }
  0x4f   : > { %3180 = vmatmul.msk.f32.gmra.mxu0 %vm633_vm2, %v603_v11 }
  0x57   : > { %3181 = vmatmul.msk.f32.gmra.mxu0 %vm633_vm2, %v604_v12 }
  0x5f   : > { %3182 = vmatmul.msk.f32.gmra.mxu0 %vm633_vm2, %v605_v13 }
  0x67   : > { %3183 = vmatmul.msk.f32.gmra.mxu0 %vm633_vm2, %v606_v14 }
  0x6f   : > { %3184 = vmatmul.msk.f32.gmra.mxu0 %vm633_vm2, %v607_v15 }
  0x77   : > { %3185 = vmatmul.msk.f32.gmra.mxu0 %vm633_vm2, %v608_v16 }
  0x7f   : > { %3186 = vmatmul.msk.f32.gmra.mxu0 %vm633_vm2, %v609_v17 }
  0x87   : > { %3187 = vmatmul.msk.f32.gmra.mxu0 %vm633_vm2, %v610_v18 }
  0x8f   : > { %3188 = vmatmul.msk.f32.gmra.mxu0 %vm633_vm2, %v611_v19 }
  0x97   : > { %3189 = vmatmul.msk.f32.gmra.mxu0 %vm633_vm2, %v612_v20 }
  0x9f   : > { %3190 = vmatmul.msk.f32.gmra.mxu0 %vm633_vm2, %v613_v21 }
  0xa4   : > { %v3765_v22 = vpop.f32.mrf.mxu0 }
  0xa5   : > { %v743_v17 = vadd.f32 %v3804_v50, %v3765_v22 }
  0xa7   : > { %3191 = vmatmul.msk.f32.gmra.mxu0 %vm633_vm2, %v614_v23 }
  0xac   : > { %v3769_v24 = vpop.f32.mrf.mxu0 }
  0xad   : > { %v746_v15 = vadd.f32 %v3804_v50, %v3769_v24 }
  0xaf   : > { %3192 = vmatmul.msk.f32.gmra.mxu0 %vm633_vm2, %v615_v25 }
  0xb4   : > { %v3773_v26 = vpop.f32.mrf.mxu0 }
  0xb5   : > { %v749_v13 = vadd.f32 %v3804_v50, %v3773_v26 }
  0xb7   : > { %3193 = vmatmul.msk.f32.gmra.mxu0 %vm633_vm2, %v616_v27 }
  0xbc   : > { %v3777_v28 = vpop.f32.mrf.mxu0 }
  0xbd   : > { %v752_v10 = vadd.f32 %v3804_v50, %v3777_v28 }
  0xbf   : > { %3194 = vmatmul.msk.f32.gmra.mxu0 %vm633_vm2, %v617_v29 }
  0xc4   : > { %v3781_v30 = vpop.f32.mrf.mxu0 }
  0xc5   : > { %v755_v8 = vadd.f32 %v3804_v50, %v3781_v30 }
  0xc7   : > { %3195 = vmatmul.msk.f32.gmra.mxu0 %vm633_vm2, %v618_v31 }
  0xcc   : > { %v757_v32 = vpop.f32.mrf.mxu0 }
  0xcd   : > { %v758_v6 = vadd.f32 %v3804_v50, %v757_v32 }
  0xcf   : > { %3196 = vmatmul.msk.f32.gmra.mxu0 %vm633_vm2, %v619_v33 }
  0xd4   : > { %v760_v34 = vpop.f32.mrf.mxu0 }
  0xd5   : > { %v761_v4 = vadd.f32 %v3804_v50, %v760_v34 }
  0xd7   : > { %3197 = vmatmul.msk.f32.gmra.mxu0 %vm633_vm2, %v620_v35 }
  0xdc   : > { %v763_v36 = vpop.f32.mrf.mxu0 }
  0xdd   : > { %v764_v1 = vadd.f32 %v3804_v50, %v763_v36  ;;  %v858_v36 = vld [vmem:[%s5131_s5] sm:$0xff] }
  0xdf   : > { %3198 = vmatmul.msk.f32.gmra.mxu0 %vm633_vm2, %v621_v37 }
  0xe4   : > { %v766_v38 = vpop.f32.mrf.mxu0 }
  0xe5   : > { %v767_v63 = vadd.f32 %v3804_v50, %v766_v38 }
  0xe7   : > { %3199 = vmatmul.msk.f32.gmra.mxu0 %vm633_vm2, %v622_v39 }
  0xec   : > { %v769_v40 = vpop.f32.mrf.mxu0 }
  0xed   : > { %v770_v61 = vadd.f32 %v3804_v50, %v769_v40 }
  0xef   : > { %3200 = vmatmul.msk.f32.gmra.mxu0 %vm633_vm2, %v623_v41 }
  0xf4   : > { %v772_v42 = vpop.f32.mrf.mxu0 }
  0xf5   : > { %v773_v59 = vadd.f32 %v3804_v50, %v772_v42 }
  0xf7   : > { %3201 = vmatmul.msk.f32.gmra.mxu0 %vm633_vm2, %v624_v43  ;;  %v860_v43 = vld [vmem:[%s5131_s5 + $0x10] sm:$0xff] }
  0xfc   : > { %v775_v44 = vpop.f32.mrf.mxu0 }
  0xfd   : > { %v776_v56 = vadd.f32 %v3804_v50, %v775_v44 }
  0xff   : > { %3202 = vmatmul.msk.f32.gmra.mxu0 %vm633_vm2, %v625_v45 }
 0x104   : > { %v778_v46 = vpop.f32.mrf.mxu0 }
 0x105   : > { %v779_v55 = vadd.f32 %v3804_v50, %v778_v46 }
 0x107   : > { %3203 = vmatmul.msk.f32.gmra.mxu0 %vm633_vm2, %v626_v47 }
 0x10c   : > { %v781_v48 = vpop.f32.mrf.mxu0 }
 0x10d   : > { %v782_v54 = vadd.f32 %v3804_v50, %v781_v48 }
 0x114   : > { %v784_v49 = vpop.f32.mrf.mxu0 }
 0x115   : > { %v785_v52 = vadd.f32 %v3804_v50, %v784_v49 }
 0x11c   : > { %v787_v51 = vpop.f32.mrf.mxu0 }
 0x11d   : > { %v788_v53 = vadd.f32 %v3804_v50, %v787_v51 }
 0x11f   : > { %3501 = vtanh.f32 %v788_v53  ;;  %v862_v53 = vld [vmem:[%s5131_s5 + $0x20] sm:$0xff] }
 0x120   : > { %3503 = vtanh.f32 %v785_v52 }
 0x121   : > { %3505 = vtanh.f32 %v782_v54 }
 0x122   : > { %3507 = vtanh.f32 %v779_v55 }
 0x123   : > { %3509 = vtanh.f32 %v776_v56 }
 0x124   : > { %v3811_v57 = vpop.f32.mrf.mxu0  ;;  %3511 = vtanh.f32 %v773_v59 }
 0x125   : > { %v3502_v58 = vpop.eup %3501  ;;  %3513 = vtanh.f32 %v770_v61  ;;  %v864_v61 = vld [vmem:[%s5131_s5 + $0x30] sm:$0xff] }
 0x126   : > { %1177 = vmatpush.msra.mxu1 %v3502_v58  ;;  %v3504_v60 = vpop.eup %3503  ;;  %3515 = vtanh.f32 %v767_v63  ;;  %v791_v58 = vadd.f32 %v3804_v50, %v3811_v57 }
 0x127   : > { %v3506_v62 = vpop.eup %3505  ;;  %3517 = vtanh.f32 %v764_v1  ;;  %v861_v1 = vld [vmem:[%s5131_s5 + $0x18] sm:$0xff] }
 0x128   : > { %1178 = vmatpush.msra.mxu1 %v3504_v60  ;;  %v3508_v0 = vpop.eup %3507  ;;  %3519 = vtanh.f32 %v761_v4  ;;  %v870_v4 = vld [vmem:[%s5131_s5 + $0x60] sm:$0xff] }
 0x129   : > { %v3510_v3 = vpop.eup %3509  ;;  %3521 = vtanh.f32 %v758_v6  ;;  %v872_v6 = vld [vmem:[%s5131_s5 + $0x70] sm:$0xff] }
 0x12a   : > { %1179 = vmatpush.msra.mxu1 %v3506_v62  ;;  %v3512_v5 = vpop.eup %3511  ;;  %3523 = vtanh.f32 %v755_v8  ;;  %v874_v8 = vld [vmem:[%s5131_s5 + $0x80] sm:$0xff] }
 0x12b   : > { %v3514_v7 = vpop.eup %3513  ;;  %3525 = vtanh.f32 %v752_v10  ;;  %v876_v10 = vld [vmem:[%s5131_s5 + $0x90] sm:$0xff] }
 0x12c   : > { %v3817_v2 = vpop.f32.mrf.mxu0  ;;  %1180 = vmatpush.msra.mxu1 %v3508_v0  ;;  %v3516_v9 = vpop.eup %3515  ;;  %3527 = vtanh.f32 %v749_v13  ;;  %v866_v0 = vld [vmem:[%s5131_s5 + $0x40] sm:$0xff]  ;;  %v873_v13 = vld [vmem:[%s5131_s5 + $0x78] sm:$0xff] }
 0x12d   : > { %v3518_v12 = vpop.eup %3517  ;;  %3529 = vtanh.f32 %v746_v15  ;;  %v794_v55 = vadd.f32 %v3804_v50, %v3817_v2  ;;  %v868_v2 = vld [vmem:[%s5131_s5 + $0x50] sm:$0xff]  ;;  %v875_v15 = vld [vmem:[%s5131_s5 + $0x88] sm:$0xff] }
 0x12e   : > { %1181 = vmatpush.msra.mxu1 %v3510_v3  ;;  %v3520_v14 = vpop.eup %3519  ;;  %3531 = vtanh.f32 %v743_v17  ;;  %v863_v3 = vld [vmem:[%s5131_s5 + $0x28] sm:$0xff]  ;;  %v877_v17 = vld [vmem:[%s5131_s5 + $0x98] sm:$0xff] }
 0x12f   : > { %v3522_v16 = vpop.eup %3521 }
 0x130   : > { %1182 = vmatpush.msra.mxu1 %v3512_v5  ;;  %v3524_v18 = vpop.eup %3523  ;;  %v865_v5 = vld [vmem:[%s5131_s5 + $0x38] sm:$0xff] }
 0x131   : > { %v3526_v20 = vpop.eup %3525 }
 0x132   : > { %1183 = vmatpush.msra.mxu1 %v3514_v7  ;;  %v3528_v21 = vpop.eup %3527  ;;  %v867_v7 = vld [vmem:[%s5131_s5 + $0x48] sm:$0xff] }
 0x133   : > { %v3530_v23 = vpop.eup %3529 }
 0x134   : > { %v3825_v11 = vpop.f32.mrf.mxu0  ;;  %1184 = vmatpush.msra.mxu1 %v3516_v9  ;;  %v3532_v24 = vpop.eup %3531  ;;  %v869_v9 = vld [vmem:[%s5131_s5 + $0x58] sm:$0xff] }
 0x135   : > { %v797_v52 = vadd.f32 %v3804_v50, %v3825_v11  ;;  %v871_v11 = vld [vmem:[%s5131_s5 + $0x68] sm:$0xff] }
 0x136   : > { %1185 = vmatpush.msra.mxu1 %v3518_v12  ;;  %v878_v12 = vld [vmem:[%s5131_s5 + $0xa0] sm:$0xff] }
 0x138   : > { %1186 = vmatpush.msra.mxu1 %v3520_v14  ;;  %v880_v14 = vld [vmem:[%s5131_s5 + $0xb0] sm:$0xff] }
 0x13a   : > { %1187 = vmatpush.msra.mxu1 %v3522_v16  ;;  %v882_v16 = vld [vmem:[%s5131_s5 + $0xc0] sm:$0xff] }
 0x13c   : > { %v799_v19 = vpop.f32.mrf.mxu0  ;;  %1188 = vmatpush.msra.mxu1 %v3524_v18  ;;  %v884_v18 = vld [vmem:[%s5131_s5 + $0xd0] sm:$0xff] }
 0x13d   : > { %v800_v49 = vadd.f32 %v3804_v50, %v799_v19  ;;  %v879_v19 = vld [vmem:[%s5131_s5 + $0xa8] sm:$0xff] }
 0x13e   : > { %1189 = vmatpush.msra.mxu1 %v3526_v20  ;;  %v886_v20 = vld [vmem:[%s5131_s5 + $0xe0] sm:$0xff] }
 0x140   : > { %1190 = vmatpush.msra.mxu1 %v3528_v21  ;;  %v881_v21 = vld [vmem:[%s5131_s5 + $0xb8] sm:$0xff] }
 0x142   : > { %1191 = vmatpush.msra.mxu1 %v3530_v23  ;;  %v888_v23 = vld [vmem:[%s5131_s5 + $0xf0] sm:$0xff] }
 0x144   : > { %v802_v25 = vpop.f32.mrf.mxu0  ;;  %1192 = vmatpush.msra.mxu1 %v3532_v24  ;;  %v883_v24 = vld [vmem:[%s5131_s5 + $0xc8] sm:$0xff] }
 0x145   : > { %1193 = vmatmul.f32.vlgmr.msra.gmra.mxu1 %v858_v36  ;;  %v803_v47 = vadd.f32 %v3804_v50, %v802_v25 }
 0x14c   : > { %v805_v26 = vpop.f32.mrf.mxu0 }
 0x14d   : > { %1196 = vmatmul.f32.gmra.mxu1 %v860_v43  ;;  %v806_v45 = vadd.f32 %v3804_v50, %v805_v26  ;;  %v890_v26 = vld [vmem:[%s5131_s5 + $0x100] sm:$0xff] }
 0x154   : > { %v808_v27 = vpop.f32.mrf.mxu0 }
 0x155   : > { %v809_v42 = vadd.f32 %v3804_v50, %v808_v27  ;;  %1199 = vmatmul.f32.gmra.mxu1 %v862_v53  ;;  %v885_v27 = vld [vmem:[%s5131_s5 + $0xd8] sm:$0xff]  ;;  %v3270_v53 = vld [vmem:[%s5132_s6 + $0x30] sm:$0xff] }
 0x15c   : > { %v811_v28 = vpop.f32.mrf.mxu0 }
 0x15d   : > { %v812_v40 = vadd.f32 %v3804_v50, %v811_v28  ;;  %1202 = vmatmul.f32.gmra.mxu1 %v864_v61  ;;  %v899_v61 = vld [vmem:[%s5131_s5 + $0x148] sm:$0xff] }
 0x164   : > { %v814_v22 = vpop.f32.mrf.mxu0 }
 0x165   : > { %v815_v38 = vadd.f32 %v3804_v50, %v814_v22  ;;  %1205 = vmatmul.f32.gmra.mxu1 %v866_v0  ;;  %v892_v22 = vld [vmem:[%s5131_s5 + $0x110] sm:$0xff]  ;;  %v901_v0 = vld [vmem:[%s5131_s5 + $0x158] sm:$0xff] }
 0x16c   : > { %v817_v29 = vpop.f32.mrf.mxu0 }
 0x16d   : > { %v818_v37 = vadd.f32 %v3804_v50, %v817_v29  ;;  %1208 = vmatmul.f32.gmra.mxu1 %v868_v2  ;;  %v887_v29 = vld [vmem:[%s5131_s5 + $0xe8] sm:$0xff] }
 0x174   : > { %v820_v30 = vpop.f32.mrf.mxu0 }
 0x175   : > { %v821_v35 = vadd.f32 %v3804_v50, %v820_v30  ;;  %1211 = vmatmul.f32.gmra.mxu1 %v870_v4  ;;  %v908_v4 = vld [vmem:[%s5131_s5 + $0x190] sm:$0xff] }
 0x17c   : > { %v823_v31 = vpop.f32.mrf.mxu0 }
 0x17d   : > { %v824_v33 = vadd.f32 %v3804_v50, %v823_v31  ;;  %1214 = vmatmul.f32.gmra.mxu1 %v872_v6  ;;  %v894_v31 = vld [vmem:[%s5131_s5 + $0x120] sm:$0xff] }
 0x184   : > { %v826_v32 = vpop.f32.mrf.mxu0 }
 0x185   : > { %v827_v34 = vadd.f32 %v3804_v50, %v826_v32  ;;  %v859_v50 = vld [vmem:[%s5131_s5 + $0x8] sm:$0xff]  ;;  %1217 = vmatmul.f32.gmra.mxu1 %v874_v8  ;;  %v889_v32 = vld [vmem:[%s5131_s5 + $0xf8] sm:$0xff] }
 0x187   : > { %3533 = vtanh.f32 %v827_v34  ;;  %v896_v34 = vld [vmem:[%s5131_s5 + $0x130] sm:$0xff] }
 0x188   : > { %3535 = vtanh.f32 %v824_v33 }
 0x189   : > { %3537 = vtanh.f32 %v821_v35  ;;  %v891_v35 = vld [vmem:[%s5131_s5 + $0x108] sm:$0xff] }
 0x18a   : > { %3539 = vtanh.f32 %v818_v37 }
 0x18b   : > { %3541 = vtanh.f32 %v815_v38 }
 0x18c   : > { %3543 = vtanh.f32 %v812_v40  ;;  %v893_v40 = vld [vmem:[%s5131_s5 + $0x118] sm:$0xff] }
 0x18d   : > { %v3534_v39 = vpop.eup %3533  ;;  %3545 = vtanh.f32 %v809_v42  ;;  %1220 = vmatmul.f32.gmra.mxu1 %v876_v10  ;;  %v905_v10 = vld [vmem:[%s5131_s5 + $0x178] sm:$0xff] }
 0x18e   : > { %3204 = vmatpush.msk.msra.mxu2 %vm721_vm1, %v3534_v39  ;;  %v3536_v41 = vpop.eup %3535  ;;  %3547 = vtanh.f32 %v806_v45  ;;  %v898_v39 = vld [vmem:[%s5131_s5 + $0x140] sm:$0xff]  ;;  %v895_v45 = vld [vmem:[%s5131_s5 + $0x128] sm:$0xff] }
 0x18f   : > { %v3538_v44 = vpop.eup %3537  ;;  %3549 = vtanh.f32 %v803_v47 }
 0x190   : > { %1387 = vmatpush.msra.mxu2 %v3536_v41  ;;  %v3540_v46 = vpop.eup %3539  ;;  %3551 = vtanh.f32 %v800_v49  ;;  %v902_v49 = vld [vmem:[%s5131_s5 + $0x160] sm:$0xff] }
 0x191   : > { %v3542_v48 = vpop.eup %3541  ;;  %3553 = vtanh.f32 %v797_v52  ;;  %v897_v52 = vld [vmem:[%s5131_s5 + $0x138] sm:$0xff] }
 0x192   : > { %1388 = vmatpush.msra.mxu2 %v3538_v44  ;;  %v3544_v51 = vpop.eup %3543  ;;  %3555 = vtanh.f32 %v794_v55  ;;  %v900_v44 = vld [vmem:[%s5131_s5 + $0x150] sm:$0xff]  ;;  %v3269_v55 = vld [vmem:[%s5132_s6 + $0x28] sm:$0xff] }
 0x193   : > { %v3546_v54 = vpop.eup %3545  ;;  %3557 = vtanh.f32 %v791_v58 }
 0x194   : > { %1389 = vmatpush.msra.mxu2 %v3540_v46  ;;  %v3548_v56 = vpop.eup %3547 }
 0x195   : > { %v3550_v59 = vpop.eup %3549  ;;  %1223 = vmatmul.f32.gmra.mxu1 %v878_v12 }
 0x196   : > { %1390 = vmatpush.msra.mxu2 %v3542_v48  ;;  %v3552_v60 = vpop.eup %3551 }
 0x197   : > { %v3554_v62 = vpop.eup %3553 }
 0x198   : > { %1391 = vmatpush.msra.mxu2 %v3544_v51  ;;  %v3556_v63 = vpop.eup %3555  ;;  %v3271_v51 = vld [vmem:[%s5132_s6 + $0x38] sm:$0xff] }
 0x199   : > { %v3558_v57 = vpop.eup %3557  ;;  %1632 = vmatpush.msra.mxu3 %v3271_v51 }
 0x19a   : > { %1392 = vmatpush.msra.mxu2 %v3546_v54 }
 0x19b   : > { %1633 = vmatpush.msra.mxu3 %v3270_v53  ;;  %v919_v53 = vld [vmem:[%s5131_s5 + $0x1e8] sm:$0xff] }
 0x19c   : > { %1393 = vmatpush.msra.mxu2 %v3548_v56 }
 0x19d   : > { %1226 = vmatmul.f32.gmra.mxu1 %v880_v14  ;;  %1634 = vmatpush.msra.mxu3 %v3269_v55  ;;  %v912_v14 = vld [vmem:[%s5131_s5 + $0x1b0] sm:$0xff] }
 0x19e   : > { %1394 = vmatpush.msra.mxu2 %v3550_v59  ;;  %v3268_v59 = vld [vmem:[%s5132_s6 + $0x20] sm:$0xff] }
 0x19f   : > { %1635 = vmatpush.msra.mxu3 %v3268_v59  ;;  %v921_v59 = vld [vmem:[%s5131_s5 + $0x1f8] sm:$0xff] }
 0x1a0   : > { %1395 = vmatpush.msra.mxu2 %v3552_v60  ;;  %v904_v60 = vld [vmem:[%s5131_s5 + $0x170] sm:$0xff] }
 0x1a2   : > { %1396 = vmatpush.msra.mxu2 %v3554_v62 }
 0x1a4   : > { %1397 = vmatpush.msra.mxu2 %v3556_v63 }
 0x1a5   : > { %1229 = vmatmul.f32.gmra.mxu1 %v882_v16 }
 0x1a6   : > { %1398 = vmatpush.msra.mxu2 %v3558_v57  ;;  %v906_v57 = vld [vmem:[%s5131_s5 + $0x180] sm:$0xff] }
 0x1a7   : > { %3205 = vmatmul.msk.f32.vlgmr.msra.gmra.mxu2 %vm984_vm3, %v859_v50 }
 0x1ad   : > { %1232 = vmatmul.f32.gmra.mxu1 %v884_v18 }
 0x1af   : > { %3206 = vmatmul.msk.f32.gmra.mxu2 %vm984_vm3, %v861_v1 }
 0x1b5   : > { %1235 = vmatmul.f32.gmra.mxu1 %v886_v20  ;;  %v909_v20 = vld [vmem:[%s5131_s5 + $0x198] sm:$0xff] }
 0x1b7   : > { %3207 = vmatmul.msk.f32.gmra.mxu2 %vm984_vm3, %v863_v3 }
 0x1bd   : > { %1238 = vmatmul.f32.gmra.mxu1 %v888_v23 }
 0x1bf   : > { %3208 = vmatmul.msk.f32.gmra.mxu2 %vm984_vm3, %v865_v5  ;;  %v903_v5 = vld [vmem:[%s5131_s5 + $0x168] sm:$0xff] }
 0x1c2   : > { %v1194_v25 = vpop.f32.mrf.mxu1 }
 0x1c5   : > { %1241 = vmatmul.f32.gmra.mxu1 %v890_v26  ;;  %v911_v26 = vld [vmem:[%s5131_s5 + $0x1a8] sm:$0xff] }
 0x1c7   : > { %3209 = vmatmul.msk.f32.gmra.mxu2 %vm984_vm3, %v867_v7 }
 0x1ca   : > { %v1197_v28 = vpop.f32.mrf.mxu1 }
 0x1cd   : > { %1244 = vmatmul.f32.gmra.mxu1 %v892_v22 }
 0x1cf   : > { %3210 = vmatmul.msk.f32.gmra.mxu2 %vm984_vm3, %v869_v9  ;;  %v910_v9 = vld [vmem:[%s5131_s5 + $0x1a0] sm:$0xff] }
 0x1d2   : > { %v1200_v30 = vpop.f32.mrf.mxu1 }
 0x1d5   : > { %1247 = vmatmul.f32.gmra.mxu1 %v894_v31 }
 0x1d7   : > { %3211 = vmatmul.msk.f32.gmra.mxu2 %vm984_vm3, %v871_v11 }
 0x1da   : > { %v1203_v33 = vpop.f32.mrf.mxu1 }
 0x1dd   : > { %1250 = vmatmul.f32.gmra.mxu1 %v896_v34  ;;  %v913_v34 = vld [vmem:[%s5131_s5 + $0x1b8] sm:$0xff] }
 0x1df   : > { %3212 = vmatmul.msk.f32.gmra.mxu2 %vm984_vm3, %v873_v13 }
 0x1e2   : > { %v1206_v36 = vpop.f32.mrf.mxu1 }
 0x1e5   : > { %1253 = vmatmul.f32.gmra.mxu1 %v898_v39  ;;  %v920_v39 = vld [vmem:[%s5131_s5 + $0x1f0] sm:$0xff] }
 0x1e7   : > { %3213 = vmatmul.msk.f32.gmra.mxu2 %vm984_vm3, %v875_v15  ;;  %v907_v15 = vld [vmem:[%s5131_s5 + $0x188] sm:$0xff] }
 0x1ea   : > { %v1209_v41 = vpop.f32.mrf.mxu1 }
 0x1ed   : > { %1256 = vmatmul.f32.gmra.mxu1 %v900_v44 }
 0x1ef   : > { %3214 = vmatmul.msk.f32.gmra.mxu2 %vm984_vm3, %v877_v17 }
 0x1f2   : > { %v1212_v46 = vpop.f32.mrf.mxu1 }
 0x1f5   : > { %1259 = vmatmul.f32.gmra.mxu1 %v902_v49 }
 0x1f7   : > { %3215 = vmatmul.msk.f32.gmra.mxu2 %vm984_vm3, %v879_v19  ;;  %v914_v19 = vld [vmem:[%s5131_s5 + $0x1c0] sm:$0xff] }
 0x1fa   : > { %v1215_v54 = vpop.f32.mrf.mxu1 }
 0x1fd   : > { %1262 = vmatmul.f32.gmra.mxu1 %v904_v60 }
 0x1ff   : > { %3216 = vmatmul.msk.f32.gmra.mxu2 %vm984_vm3, %v881_v21 }
 0x202   : > { %v1218_v62 = vpop.f32.mrf.mxu1 }
 0x205   : > { %1265 = vmatmul.f32.gmra.mxu1 %v906_v57 }
 0x207   : > { %3217 = vmatmul.msk.f32.gmra.mxu2 %vm984_vm3, %v883_v24 }
 0x20a   : > { %v1221_v1 = vpop.f32.mrf.mxu1 }
 0x20d   : > { %1268 = vmatmul.f32.gmra.mxu1 %v908_v4 }
 0x20f   : > { %3218 = vmatmul.msk.f32.gmra.mxu2 %vm984_vm3, %v885_v27  ;;  %v1592_v27 = vld [vmem:[%s5132_s6 + $0x18] sm:$0xff] }
 0x210   : > { %1691 = vmatpush.msrb.mxu3 %v1592_v27  ;;  %v3322_v27 = vld [vmem:[%s5132_s6 + $0xb8] sm:$0xff] }
 0x211   : > { %1968 = vmatpush.msrb.mxu0 %v3322_v27  ;;  %v3320_v27 = vld [vmem:[%s5132_s6 + $0xa8] sm:$0xff] }
 0x212   : > { %v1224_v6 = vpop.f32.mrf.mxu1 }
 0x215   : > { %1271 = vmatmul.f32.gmra.mxu1 %v910_v9  ;;  %v927_v9 = vld [vmem:[%s5131_s5 + $0x228] sm:$0xff] }
 0x217   : > { %3219 = vmatmul.msk.f32.gmra.mxu2 %vm984_vm3, %v887_v29  ;;  %v1590_v29 = vld [vmem:[%s5132_s6 + $0x8] sm:$0xff] }
 0x21a   : > { %v1227_v11 = vpop.f32.mrf.mxu1 }
 0x21d   : > { %1274 = vmatmul.f32.gmra.mxu1 %v912_v14 }
 0x21f   : > { %3220 = vmatmul.msk.f32.gmra.mxu2 %vm984_vm3, %v889_v32  ;;  %v1589_v32 = vld [vmem:[%s5132_s6] sm:$0xff] }
 0x222   : > { %v1230_v16 = vpop.f32.mrf.mxu1 }
 0x225   : > { %1277 = vmatmul.f32.gmra.mxu1 %v914_v19  ;;  %v933_v19 = vld [vmem:[%s5131_s5 + $0x258] sm:$0xff] }
 0x227   : > { %3221 = vmatmul.msk.f32.gmra.mxu2 %vm984_vm3, %v891_v35 }
 0x22a   : > { %v1400_v37 = vpop.f32.mrf.mxu2  ;;  %v1233_v21 = vpop.f32.mrf.mxu1 }
 0x22b   : > { %v3978_v38 = vadd.f32 %v1400_v37, %v1194_v25  ;;  %v916_v25 = vld [vmem:[%s5131_s5 + $0x1d0] sm:$0xff] }
 0x22d   : > { %1280 = vmatmul.f32.gmra.mxu1 %v916_v25 }
 0x22f   : > { %3222 = vmatmul.msk.f32.gmra.mxu2 %vm984_vm3, %v893_v40  ;;  %v915_v40 = vld [vmem:[%s5131_s5 + $0x1c8] sm:$0xff] }
 0x232   : > { %v1403_v42 = vpop.f32.mrf.mxu2  ;;  %v4083_v22 = vpop.f32.mrf.mxu1 }
 0x233   : > { %v3987_v43 = vadd.f32 %v1403_v42, %v1197_v28  ;;  %v1591_v28 = vld [vmem:[%s5132_s6 + $0x10] sm:$0xff] }
 0x234   : > { %1692 = vmatpush.msrb.mxu3 %v1591_v28  ;;  %v942_v28 = vld [vmem:[%s5131_s5 + $0x2a0] sm:$0xff] }
 0x236   : > { %1693 = vmatpush.msrb.mxu3 %v1590_v29 }
 0x237   : > { %3223 = vmatmul.msk.f32.gmra.mxu2 %vm984_vm3, %v895_v45  ;;  %v922_v45 = vld [vmem:[%s5131_s5 + $0x200] sm:$0xff] }
 0x238   : > { %1694 = vmatpush.msrb.mxu3 %v1589_v32  ;;  %v944_v32 = vld [vmem:[%s5131_s5 + $0x2b0] sm:$0xff] }
 0x23a   : > { %v1406_v47 = vpop.f32.mrf.mxu2  ;;  %v4099_v35 = vpop.f32.mrf.mxu1 }
 0x23b   : > { %v3996_v48 = vadd.f32 %v1406_v47, %v1200_v30 }
 0x23f   : > { %3224 = vmatmul.msk.f32.gmra.mxu2 %vm984_vm3, %v897_v52  ;;  %v924_v52 = vld [vmem:[%s5131_s5 + $0x210] sm:$0xff] }
 0x242   : > { %v1409_v56 = vpop.f32.mrf.mxu2 }
 0x243   : > { %v4014_v58 = vadd.f32 %v1409_v56, %v1203_v33  ;;  %v918_v33 = vld [vmem:[%s5131_s5 + $0x1e0] sm:$0xff] }
 0x244   : > { %1283 = vmatmul.f32.gmra.mxu1 %v918_v33  ;;  %v926_v56 = vld [vmem:[%s5131_s5 + $0x220] sm:$0xff]  ;;  %v939_v33 = vld [vmem:[%s5131_s5 + $0x288] sm:$0xff] }
 0x247   : > { %3225 = vmatmul.msk.f32.gmra.mxu2 %vm984_vm3, %v899_v61 }
 0x24a   : > { %v1412_v63 = vpop.f32.mrf.mxu2 }
 0x24b   : > { %v4026_v50 = vadd.f32 %v1412_v63, %v1206_v36  ;;  %v923_v63 = vld [vmem:[%s5131_s5 + $0x208] sm:$0xff] }
 0x24c   : > { %1286 = vmatmul.f32.gmra.mxu1 %v920_v39  ;;  %v3298_v39 = vld [vmem:[%s5132_s6 + $0x68] sm:$0xff] }
 0x24f   : > { %3226 = vmatmul.msk.f32.gmra.mxu2 %vm984_vm3, %v901_v0  ;;  %v930_v0 = vld [vmem:[%s5131_s5 + $0x240] sm:$0xff] }
 0x252   : > { %v1415_v2 = vpop.f32.mrf.mxu2 }
 0x253   : > { %v4035_v3 = vadd.f32 %v1415_v2, %v1209_v41  ;;  %v4109_v41 = vpop.f32.mrf.mxu1  ;;  %v3288_v2 = vld [vmem:[%s5132_s6 + $0x50] sm:$0xff] }
 0x254   : > { %1289 = vmatmul.f32.gmra.mxu1 %v922_v45  ;;  %v941_v45 = vld [vmem:[%s5131_s5 + $0x298] sm:$0xff] }
 0x257   : > { %3227 = vmatmul.msk.f32.gmra.mxu2 %vm984_vm3, %v903_v5  ;;  %v3287_v5 = vld [vmem:[%s5132_s6 + $0x48] sm:$0xff] }
 0x25a   : > { %v1418_v7 = vpop.f32.mrf.mxu2 }
 0x25b   : > { %v4044_v8 = vadd.f32 %v1418_v7, %v1212_v46  ;;  %v917_v46 = vld [vmem:[%s5131_s5 + $0x1d8] sm:$0xff]  ;;  %v4119_v47 = vpop.f32.mrf.mxu1  ;;  %v932_v7 = vld [vmem:[%s5131_s5 + $0x250] sm:$0xff] }
 0x25c   : > { %1292 = vmatmul.f32.gmra.mxu1 %v924_v52  ;;  %v948_v52 = vld [vmem:[%s5131_s5 + $0x2d0] sm:$0xff] }
 0x25f   : > { %3228 = vmatmul.msk.f32.gmra.mxu2 %vm984_vm3, %v905_v10 }
 0x262   : > { %v1421_v12 = vpop.f32.mrf.mxu2 }
 0x263   : > { %v1422_v13 = vadd.f32 %v1421_v12, %v1215_v54  ;;  %v4129_v54 = vpop.f32.mrf.mxu1  ;;  %v934_v12 = vld [vmem:[%s5131_s5 + $0x260] sm:$0xff] }
 0x264   : > { %1295 = vmatmul.f32.gmra.mxu1 %v926_v56 }
 0x265   : > { %3272 = vmatmul.msk.f32.vlgmr.msra.gmra.mxu3 %vm1598_vm4, %v1422_v13  ;;  %v929_v13 = vld [vmem:[%s5131_s5 + $0x238] sm:$0xff] }
 0x267   : > { %3229 = vmatmul.msk.f32.gmra.mxu2 %vm984_vm3, %v907_v15  ;;  %v936_v15 = vld [vmem:[%s5131_s5 + $0x270] sm:$0xff] }
 0x26a   : > { %v1424_v17 = vpop.f32.mrf.mxu2 }
 0x26b   : > { %v1425_v18 = vadd.f32 %v1424_v17, %v1218_v62  ;;  %v4140_v60 = vpop.f32.mrf.mxu1  ;;  %v928_v62 = vld [vmem:[%s5131_s5 + $0x230] sm:$0xff] }
 0x26c   : > { %1298 = vmatmul.f32.gmra.mxu1 %v928_v62  ;;  %v945_v62 = vld [vmem:[%s5131_s5 + $0x2b8] sm:$0xff] }
 0x26d   : > { %3273 = vmatmul.msk.f32.gmra.mxu3 %vm1598_vm4, %v1425_v18  ;;  %v938_v18 = vld [vmem:[%s5131_s5 + $0x280] sm:$0xff] }
 0x26f   : > { %3230 = vmatmul.msk.f32.gmra.mxu2 %vm984_vm3, %v909_v20 }
 0x272   : > { %v1427_v23 = vpop.f32.mrf.mxu2 }
 0x273   : > { %v1428_v24 = vadd.f32 %v1427_v23, %v1221_v1  ;;  %v925_v1 = vld [vmem:[%s5131_s5 + $0x218] sm:$0xff]  ;;  %v940_v23 = vld [vmem:[%s5131_s5 + $0x290] sm:$0xff] }
 0x274   : > { %1301 = vmatmul.f32.gmra.mxu1 %v930_v0 }
 0x275   : > { %3274 = vmatmul.msk.f32.gmra.mxu3 %vm1598_vm4, %v1428_v24  ;;  %v935_v24 = vld [vmem:[%s5131_s5 + $0x268] sm:$0xff] }
 0x277   : > { %3231 = vmatmul.msk.f32.gmra.mxu2 %vm984_vm3, %v911_v26 }
 0x27a   : > { %v1430_v30 = vpop.f32.mrf.mxu2 }
 0x27b   : > { %v1431_v31 = vadd.f32 %v1430_v30, %v1224_v6 }
 0x27c   : > { %1304 = vmatmul.f32.gmra.mxu1 %v932_v7  ;;  %v949_v7 = vld [vmem:[%s5131_s5 + $0x2d8] sm:$0xff] }
 0x27d   : > { %3275 = vmatmul.msk.f32.gmra.mxu3 %vm1598_vm4, %v1431_v31 }
 0x27f   : > { %3232 = vmatmul.msk.f32.gmra.mxu2 %vm984_vm3, %v913_v34  ;;  %v3300_v34 = vld [vmem:[%s5132_s6 + $0x78] sm:$0xff] }
 0x282   : > { %v1433_v36 = vpop.f32.mrf.mxu2 }
 0x283   : > { %v1434_v37 = vadd.f32 %v1433_v36, %v1227_v11 }
 0x284   : > { %1307 = vmatmul.f32.gmra.mxu1 %v934_v12 }
 0x285   : > { %3276 = vmatmul.msk.f32.gmra.mxu3 %vm1598_vm4, %v1434_v37 }
 0x287   : > { %3233 = vmatmul.msk.f32.gmra.mxu2 %vm984_vm3, %v915_v40 }
 0x28a   : > { %v1436_v42 = vpop.f32.mrf.mxu2 }
 0x28b   : > { %v1437_v44 = vadd.f32 %v1436_v42, %v1230_v16  ;;  %v931_v16 = vld [vmem:[%s5131_s5 + $0x248] sm:$0xff]  ;;  %v3297_v42 = vld [vmem:[%s5132_s6 + $0x60] sm:$0xff] }
 0x28c   : > { %1310 = vmatmul.f32.gmra.mxu1 %v936_v15  ;;  %v3321_v15 = vld [vmem:[%s5132_s6 + $0xb0] sm:$0xff] }
 0x28d   : > { %3277 = vmatmul.msk.f32.gmra.mxu3 %vm1598_vm4, %v1437_v44  ;;  %v946_v44 = vld [vmem:[%s5131_s5 + $0x2c0] sm:$0xff]  ;;  %1969 = vmatpush.msrb.mxu0 %v3321_v15 }
 0x28f   : > { %3234 = vmatmul.msk.f32.gmra.mxu2 %vm984_vm3, %v917_v46  ;;  %1970 = vmatpush.msrb.mxu0 %v3320_v27 }
 0x292   : > { %v1439_v49 = vpop.f32.mrf.mxu2 }
 0x293   : > { %v1440_v51 = vadd.f32 %v1439_v49, %v1233_v21 }
 0x294   : > { %1313 = vmatmul.f32.gmra.mxu1 %v938_v18 }
 0x295   : > { %3278 = vmatmul.msk.f32.gmra.mxu3 %vm1598_vm4, %v1440_v51 }
 0x297   : > { %3235 = vmatmul.msk.f32.gmra.mxu2 %vm984_vm3, %v919_v53  ;;  %v943_v53 = vld [vmem:[%s5131_s5 + $0x2a8] sm:$0xff] }
 0x29a   : > { %v1442_v55 = vpop.f32.mrf.mxu2 }
 0x29b   : > { %v1443_v21 = vadd.f32 %v1442_v55, %v4083_v22  ;;  %v937_v22 = vld [vmem:[%s5131_s5 + $0x278] sm:$0xff] }
 0x29c   : > { %1316 = vmatmul.f32.gmra.mxu1 %v940_v23 }
 0x29d   : > { %3279 = vmatmul.msk.f32.vlgmr.msrb.gmra.mxu3 %vm1598_vm4, %v3978_v38  ;;  %v4151_v38 = vpop.f32.mrf.mxu1 }
 0x29f   : > { %3236 = vmatmul.msk.f32.gmra.mxu2 %vm984_vm3, %v921_v59 }
 0x2a2   : > { %v1445_v61 = vpop.f32.mrf.mxu2 }
 0x2a3   : > { %v1446_v26 = vadd.f32 %v1445_v61, %v4099_v35  ;;  %v3299_v35 = vld [vmem:[%s5132_s6 + $0x70] sm:$0xff]  ;;  %v950_v61 = vld [vmem:[%s5131_s5 + $0x2e0] sm:$0xff] }
 0x2a4   : > { %1319 = vmatmul.f32.gmra.mxu1 %v942_v28 }
 0x2a5   : > { %3280 = vmatmul.msk.f32.gmra.mxu3 %vm1598_vm4, %v3987_v43  ;;  %v3289_v43 = vld [vmem:[%s5132_s6 + $0x58] sm:$0xff]  ;;  %v4168_v4 = vpop.f32.mrf.mxu1 }
 0x2a6   : > { %1755 = vmatpush.msra.mxu3 %v3289_v43  ;;  %v947_v43 = vld [vmem:[%s5131_s5 + $0x2c8] sm:$0xff] }
 0x2a7   : > { %3237 = vmatmul.msk.f32.gmra.mxu2 %vm984_vm3, %v923_v63 }
 0x2a8   : > { %1756 = vmatpush.msra.mxu3 %v3288_v2 }
 0x2aa   : > { %v1448_v57 = vpop.f32.mrf.mxu2  ;;  %1757 = vmatpush.msra.mxu3 %v3287_v5 }
 0x2ab   : > { %v1449_v31 = vadd.f32 %v1448_v57, %v4109_v41 }
 0x2ac   : > { %1322 = vmatmul.f32.gmra.mxu1 %v944_v32  ;;  %v960_v32 = vld [vmem:[%s5131_s5 + $0x330] sm:$0xff] }
 0x2ad   : > { %3281 = vmatmul.msk.f32.gmra.mxu3 %vm1598_vm4, %v3996_v48  ;;  %v3286_v48 = vld [vmem:[%s5132_s6 + $0x40] sm:$0xff]  ;;  %v4187_v10 = vpop.f32.mrf.mxu1 }
 0x2ae   : > { %1758 = vmatpush.msra.mxu3 %v3286_v48  ;;  %v954_v48 = vld [vmem:[%s5131_s5 + $0x300] sm:$0xff] }
 0x2af   : > { %3238 = vmatmul.msk.f32.gmra.mxu2 %vm984_vm3, %v925_v1  ;;  %v952_v1 = vld [vmem:[%s5131_s5 + $0x2f0] sm:$0xff] }
 0x2b0   : > { %1826 = vmatpush.msrb.mxu3 %v3300_v34 }
 0x2b2   : > { %v4173_v6 = vpop.f32.mrf.mxu2  ;;  %1827 = vmatpush.msrb.mxu3 %v3299_v35 }
 0x2b3   : > { %v1452_v41 = vadd.f32 %v4173_v6, %v4119_v47 }
 0x2b4   : > { %1828 = vmatpush.msrb.mxu3 %v3298_v39  ;;  %1325 = vmatmul.f32.gmra.mxu1 %v946_v44 }
 0x2b5   : > { %3282 = vmatmul.msk.f32.gmra.mxu3 %vm1598_vm4, %v4014_v58  ;;  %v4200_v58 = vpop.f32.mrf.mxu1 }
 0x2b6   : > { %1829 = vmatpush.msrb.mxu3 %v3297_v42 }
 0x2b7   : > { %3239 = vmatmul.msk.f32.gmra.mxu2 %vm984_vm3, %v927_v9 }
 0x2ba   : > { %v4189_v11 = vpop.f32.mrf.mxu2 }
 0x2bb   : > { %v1455_v51 = vadd.f32 %v4189_v11, %v4129_v54 }
 0x2bc   : > { %1328 = vmatmul.f32.gmra.mxu1 %v948_v52 }
 0x2bd   : > { %3283 = vmatmul.msk.f32.gmra.mxu3 %vm1598_vm4, %v4026_v50  ;;  %v4213_v50 = vpop.f32.mrf.mxu1 }
 0x2bf   : > { %3240 = vmatmul.msk.f32.gmra.mxu2 %vm984_vm3, %v929_v13  ;;  %v956_v13 = vld [vmem:[%s5131_s5 + $0x310] sm:$0xff] }
 0x2c2   : > { %v4202_v14 = vpop.f32.mrf.mxu2 }
 0x2c3   : > { %v1458_v54 = vadd.f32 %v4202_v14, %v4140_v60  ;;  %v951_v14 = vld [vmem:[%s5131_s5 + $0x2e8] sm:$0xff] }
 0x2c4   : > { %1331 = vmatmul.f32.gmra.mxu1 %v950_v61  ;;  %v961_v61 = vld [vmem:[%s5131_s5 + $0x338] sm:$0xff] }
 0x2c5   : > { %3284 = vmatmul.msk.f32.gmra.mxu3 %vm1598_vm4, %v4035_v3  ;;  %v4226_v3 = vpop.f32.mrf.mxu1 }
 0x2c7   : > { %3241 = vmatmul.msk.f32.gmra.mxu2 %vm984_vm3, %v931_v16 }
 0x2ca   : > { %v4215_v17 = vpop.f32.mrf.mxu2 }
 0x2cb   : > { %v1461_v60 = vadd.f32 %v4215_v17, %v4151_v38 }
 0x2cc   : > { %1334 = vmatmul.f32.gmra.mxu1 %v952_v1 }
 0x2cd   : > { %3285 = vmatmul.msk.f32.gmra.mxu3 %vm1598_vm4, %v4044_v8  ;;  %v4239_v8 = vpop.f32.mrf.mxu1 }
 0x2cf   : > { %3242 = vmatmul.msk.f32.gmra.mxu2 %vm984_vm3, %v933_v19  ;;  %v958_v19 = vld [vmem:[%s5131_s5 + $0x320] sm:$0xff] }
 0x2d2   : > { %v4228_v20 = vpop.f32.mrf.mxu2 }
 0x2d3   : > { %v1464_v38 = vadd.f32 %v4228_v20, %v4168_v4  ;;  %v953_v20 = vld [vmem:[%s5131_s5 + $0x2f8] sm:$0xff] }
 0x2d4   : > { %1337 = vmatmul.f32.gmra.mxu1 %v954_v48 }
 0x2d5   : > { %3290 = vmatmul.msk.f32.vlgmr.msra.gmra.mxu3 %vm1598_vm4, %v1443_v21  ;;  %v4255_v29 = vpop.f32.mrf.mxu1  ;;  %v3311_v21 = vld [vmem:[%s5132_s6 + $0x98] sm:$0xff] }
 0x2d6   : > { %1897 = vmatpush.msra.mxu3 %v3311_v21  ;;  %v967_v21 = vld [vmem:[%s5131_s5 + $0x368] sm:$0xff] }
 0x2d7   : > { %3243 = vmatmul.msk.f32.gmra.mxu2 %vm984_vm3, %v935_v24 }
 0x2da   : > { %v4241_v25 = vpop.f32.mrf.mxu2 }
 0x2db   : > { %v1467_v4 = vadd.f32 %v4241_v25, %v4187_v10 }
 0x2dc   : > { %1340 = vmatmul.f32.gmra.mxu1 %v956_v13  ;;  %v970_v13 = vld [vmem:[%s5131_s5 + $0x380] sm:$0xff] }
 0x2dd   : > { %3291 = vmatmul.msk.f32.gmra.mxu3 %vm1598_vm4, %v1446_v26  ;;  %v4276_v37 = vpop.f32.mrf.mxu1  ;;  %v3309_v26 = vld [vmem:[%s5132_s6 + $0x88] sm:$0xff] }
 0x2df   : > { %3244 = vmatmul.msk.f32.gmra.mxu2 %vm984_vm3, %v937_v22 }
 0x2e2   : > { %v4257_v30 = vpop.f32.mrf.mxu2 }
 0x2e3   : > { %v1470_v18 = vadd.f32 %v4257_v30, %v4200_v58  ;;  %v3310_v58 = vld [vmem:[%s5132_s6 + $0x90] sm:$0xff]  ;;  %v3308_v30 = vld [vmem:[%s5132_s6 + $0x80] sm:$0xff] }
 0x2e4   : > { %1343 = vmatmul.f32.gmra.mxu1 %v958_v19  ;;  %1898 = vmatpush.msra.mxu3 %v3310_v58 }
 0x2e5   : > { %3292 = vmatmul.msk.f32.gmra.mxu3 %vm1598_vm4, %v1449_v31  ;;  %v4298_v47 = vpop.f32.mrf.mxu1  ;;  %v3319_v31 = vld [vmem:[%s5132_s6 + $0xa0] sm:$0xff] }
 0x2e6   : > { %1899 = vmatpush.msra.mxu3 %v3309_v26  ;;  %1971 = vmatpush.msrb.mxu0 %v3319_v31  ;;  %v969_v31 = vld [vmem:[%s5131_s5 + $0x378] sm:$0xff] }
 0x2e7   : > { %3245 = vmatmul.msk.f32.gmra.mxu2 %vm984_vm3, %v939_v33  ;;  %v955_v33 = vld [vmem:[%s5131_s5 + $0x308] sm:$0xff] }
 0x2e8   : > { %v4274_v36 = vpop.f32.mrf.mxu3  ;;  %1900 = vmatpush.msra.mxu3 %v3308_v30  ;;  %v3330_v30 = vld [vmem:[%s5132_s6 + $0xc0] sm:$0xff] }
 0x2ea   : > { %v4281_v40 = vpop.f32.mrf.mxu2 }
 0x2eb   : > { %v1473_v22 = vadd.f32 %v4281_v40, %v4213_v50  ;;  %v962_v40 = vld [vmem:[%s5131_s5 + $0x340] sm:$0xff] }
 0x2ec   : > { %1346 = vmatmul.f32.gmra.mxu1 %v960_v32 }
 0x2ed   : > { %3293 = vmatmul.msk.f32.gmra.mxu3 %vm1598_vm4, %v1452_v41  ;;  %v4314_v56 = vpop.f32.mrf.mxu1  ;;  %v957_v41 = vld [vmem:[%s5131_s5 + $0x318] sm:$0xff] }
 0x2ef   : > { %3246 = vmatmul.msk.f32.gmra.mxu2 %vm984_vm3, %v941_v45 }
 0x2f0   : > { %v4296_v46 = vpop.f32.mrf.mxu3 }
 0x2f2   : > { %v4300_v49 = vpop.f32.mrf.mxu2 }
 0x2f3   : > { %v1476_v39 = vadd.f32 %v4300_v49, %v4226_v3  ;;  %v964_v49 = vld [vmem:[%s5131_s5 + $0x350] sm:$0xff] }
 0x2f4   : > { %1349 = vmatmul.f32.gmra.mxu1 %v962_v40  ;;  %v971_v40 = vld [vmem:[%s5131_s5 + $0x388] sm:$0xff] }
 0x2f5   : > { %3294 = vmatmul.msk.f32.gmra.mxu3 %vm1598_vm4, %v1455_v51  ;;  %v4330_v57 = vpop.f32.mrf.mxu1  ;;  %v959_v51 = vld [vmem:[%s5131_s5 + $0x328] sm:$0xff] }
 0x2f7   : > { %3247 = vmatmul.msk.f32.gmra.mxu2 %vm984_vm3, %v943_v53 }
 0x2f8   : > { %v4312_v55 = vpop.f32.mrf.mxu3 }
 0x2fa   : > { %v4316_v59 = vpop.f32.mrf.mxu2 }
 0x2fb   : > { %v1479_v3 = vadd.f32 %v4316_v59, %v4239_v8  ;;  %v966_v59 = vld [vmem:[%s5131_s5 + $0x360] sm:$0xff] }
 0x2fc   : > { %1352 = vmatmul.f32.gmra.mxu1 %v964_v49  ;;  %v973_v49 = vld [vmem:[%s5131_s5 + $0x398] sm:$0xff] }
 0x2fd   : > { %3295 = vmatmul.msk.f32.gmra.mxu3 %vm1598_vm4, %v1458_v54  ;;  %v4346_v5 = vpop.f32.mrf.mxu1 }
 0x2ff   : > { %3248 = vmatmul.msk.f32.gmra.mxu2 %vm984_vm3, %v945_v62 }
 0x300   : > { %v4328_v63 = vpop.f32.mrf.mxu3 }
 0x302   : > { %v4332_v0 = vpop.f32.mrf.mxu2 }
 0x303   : > { %v1482_v8 = vadd.f32 %v4332_v0, %v4255_v29 }
 0x304   : > { %1355 = vmatmul.f32.gmra.mxu1 %v966_v59  ;;  %v975_v59 = vld [vmem:[%s5131_s5 + $0x3a8] sm:$0xff] }
 0x305   : > { %3296 = vmatmul.msk.f32.gmra.mxu3 %vm1598_vm4, %v1461_v60  ;;  %v4362_v11 = vpop.f32.mrf.mxu1 }
 0x307   : > { %3249 = vmatmul.msk.f32.gmra.mxu2 %vm984_vm3, %v947_v43  ;;  %v968_v43 = vld [vmem:[%s5131_s5 + $0x370] sm:$0xff] }
 0x308   : > { %v4344_v2 = vpop.f32.mrf.mxu3 }
 0x30a   : > { %v4348_v6 = vpop.f32.mrf.mxu2 }
 0x30b   : > { %v1485_v29 = vadd.f32 %v4348_v6, %v4276_v37 }
 0x30c   : > { %1358 = vmatmul.f32.gmra.mxu1 %v968_v43  ;;  %v979_v43 = vld [vmem:[%s5131_s5 + $0x3c8] sm:$0xff] }
 0x30d   : > { %3301 = vmatmul.msk.f32.vlgmr.msrb.gmra.mxu3 %vm1598_vm4, %v1464_v38  ;;  %v4381_v10 = vpop.f32.mrf.mxu1  ;;  %v963_v38 = vld [vmem:[%s5131_s5 + $0x348] sm:$0xff] }
 0x30f   : > { %3250 = vmatmul.msk.f32.gmra.mxu2 %vm984_vm3, %v949_v7 }
 0x310   : > { %v4360_v9 = vpop.f32.mrf.mxu3 }
 0x312   : > { %v4364_v12 = vpop.f32.mrf.mxu2 }
 0x313   : > { %v1488_v7 = vadd.f32 %v4364_v12, %v4298_v47 }
 0x314   : > { %1361 = vmatmul.f32.gmra.mxu1 %v970_v13  ;;  %v3343_v13 = vld [vmem:[%s5132_s6 + $0xf0] sm:$0xff] }
 0x315   : > { %3302 = vmatmul.msk.f32.gmra.mxu3 %vm1598_vm4, %v1467_v4  ;;  %v1299_v25 = vpop.f32.mrf.mxu1 }
 0x317   : > { %3251 = vmatmul.msk.f32.gmra.mxu2 %vm984_vm3, %v951_v14  ;;  %v965_v14 = vld [vmem:[%s5131_s5 + $0x358] sm:$0xff] }
 0x318   : > { %v4379_v16 = vpop.f32.mrf.mxu3 }
 0x31a   : > { %v4383_v17 = vpop.f32.mrf.mxu2 }
 0x31d   : > { %3303 = vmatmul.msk.f32.gmra.mxu3 %vm1598_vm4, %v1470_v18  ;;  %v1302_v35 = vpop.f32.mrf.mxu1  ;;  %v1491_v18 = vadd.f32 %v4383_v17, %v4314_v56  ;;  %v3332_v56 = vld [vmem:[%s5132_s6 + $0xd0] sm:$0xff] }
 0x31f   : > { %3252 = vmatmul.msk.f32.gmra.mxu2 %vm984_vm3, %v953_v20  ;;  %v972_v20 = vld [vmem:[%s5131_s5 + $0x390] sm:$0xff] }
 0x320   : > { %v1696_v23 = vpop.f32.mrf.mxu3  ;;  %1364 = vmatmul.f32.gmra.mxu1 %v972_v20 }
 0x321   : > { %v4402_v24 = vadd.f32 %v1696_v23, %v4274_v36 }
 0x322   : > { %v4410_v28 = vpop.f32.mrf.mxu2 }
 0x323   : > { %v1494_v27 = vadd.f32 %v4410_v28, %v4330_v57 }
 0x325   : > { %3304 = vmatmul.msk.f32.gmra.mxu3 %vm1598_vm4, %v1473_v22  ;;  %v1305_v45 = vpop.f32.mrf.mxu1 }
 0x327   : > { %3253 = vmatmul.msk.f32.gmra.mxu2 %vm984_vm3, %v955_v33 }
 0x328   : > { %v1699_v50 = vpop.f32.mrf.mxu3 }
 0x329   : > { %v4429_v34 = vadd.f32 %v1699_v50, %v4296_v46 }
 0x32a   : > { %v4431_v36 = vpop.f32.mrf.mxu2 }
 0x32b   : > { %v1497_v50 = vadd.f32 %v4431_v36, %v4346_v5 }
 0x32d   : > { %3305 = vmatmul.msk.f32.gmra.mxu3 %vm1598_vm4, %v1476_v39  ;;  %v976_v39 = vld [vmem:[%s5131_s5 + $0x3b0] sm:$0xff] }
 0x32f   : > { %3254 = vmatmul.msk.f32.gmra.mxu2 %vm984_vm3, %v957_v41 }
 0x330   : > { %v1702_v42 = vpop.f32.mrf.mxu3 }
 0x331   : > { %v4444_v44 = vadd.f32 %v1702_v42, %v4312_v55  ;;  %v1308_v55 = vpop.f32.mrf.mxu1 }
 0x332   : > { %v4446_v46 = vpop.f32.mrf.mxu2 }
 0x333   : > { %v1500_v42 = vadd.f32 %v4446_v46, %v4362_v11 }
 0x335   : > { %3306 = vmatmul.msk.f32.gmra.mxu3 %vm1598_vm4, %v1479_v3  ;;  %v978_v3 = vld [vmem:[%s5131_s5 + $0x3c0] sm:$0xff] }
 0x337   : > { %3255 = vmatmul.msk.f32.gmra.mxu2 %vm984_vm3, %v959_v51 }
 0x338   : > { %v1705_v52 = vpop.f32.mrf.mxu3 }
 0x339   : > { %v4459_v53 = vadd.f32 %v1705_v52, %v4328_v63  ;;  %v1311_v60 = vpop.f32.mrf.mxu1 }
 0x33a   : > { %v4461_v54 = vpop.f32.mrf.mxu2 }
 0x33b   : > { %v1503_v52 = vadd.f32 %v4461_v54, %v4381_v10  ;;  %v982_v10 = vld [vmem:[%s5131_s5 + $0x3e0] sm:$0xff]  ;;  %v977_v54 = vld [vmem:[%s5131_s5 + $0x3b8] sm:$0xff] }
 0x33d   : > { %3307 = vmatmul.msk.f32.gmra.mxu3 %vm1598_vm4, %v1482_v8  ;;  %v980_v8 = vld [vmem:[%s5131_s5 + $0x3d0] sm:$0xff] }
 0x33f   : > { %3256 = vmatmul.msk.f32.gmra.mxu2 %vm984_vm3, %v961_v61 }
 0x340   : > { %v1708_v62 = vpop.f32.mrf.mxu3 }
 0x341   : > { %v4474_v63 = vadd.f32 %v1708_v62, %v4344_v2  ;;  %v1314_v37 = vpop.f32.mrf.mxu1 }
 0x342   : > { %v1505_v1 = vpop.f32.mrf.mxu2 }
 0x343   : > { %v1506_v0 = vadd.f32 %v1505_v1, %v1299_v25  ;;  %v3331_v25 = vld [vmem:[%s5132_s6 + $0xc8] sm:$0xff] }
 0x345   : > { %3312 = vmatmul.msk.f32.vlgmr.msra.gmra.mxu3 %vm1598_vm4, %v1485_v29  ;;  %3323 = vmatmul.msk.f32.vlgmr.msrb.gmra.mxu0 %vm1598_vm4, %v1506_v0 }
 0x347   : > { %3257 = vmatmul.msk.f32.gmra.mxu2 %vm984_vm3, %v963_v38 }
 0x348   : > { %v1711_v2 = vpop.f32.mrf.mxu3 }
 0x349   : > { %v4488_v48 = vadd.f32 %v1711_v2, %v4360_v9  ;;  %v1317_v47 = vpop.f32.mrf.mxu1 }
 0x34a   : > { %v1508_v6 = vpop.f32.mrf.mxu2 }
 0x34b   : > { %v1509_v4 = vadd.f32 %v1508_v6, %v1302_v35  ;;  %v981_v6 = vld [vmem:[%s5131_s5 + $0x3d8] sm:$0xff] }
 0x34d   : > { %3313 = vmatmul.msk.f32.gmra.mxu3 %vm1598_vm4, %v1488_v7  ;;  %3324 = vmatmul.msk.f32.gmra.mxu0 %vm1598_vm4, %v1509_v4  ;;  %v3344_v4 = vld [vmem:[%s5132_s6 + $0xf8] sm:$0xff] }
 0x34e   : > { %2110 = vmatpush.msra.mxu0 %v3344_v4 }
 0x34f   : > { %3258 = vmatmul.msk.f32.gmra.mxu2 %vm984_vm3, %v965_v14  ;;  %v3342_v14 = vld [vmem:[%s5132_s6 + $0xe8] sm:$0xff] }
 0x350   : > { %v1714_v9 = vpop.f32.mrf.mxu3  ;;  %2111 = vmatpush.msra.mxu0 %v3343_v13 }
 0x351   : > { %v4502_v15 = vadd.f32 %v1714_v9, %v4379_v16  ;;  %v3333_v16 = vld [vmem:[%s5132_s6 + $0xd8] sm:$0xff]  ;;  %v1320_v23 = vpop.f32.mrf.mxu1 }
 0x352   : > { %v1511_v12 = vpop.f32.mrf.mxu2  ;;  %2039 = vmatpush.msrb.mxu3 %v3333_v16  ;;  %2112 = vmatpush.msra.mxu0 %v3342_v14 }
 0x353   : > { %v1512_v19 = vadd.f32 %v1511_v12, %v1305_v45  ;;  %v3341_v12 = vld [vmem:[%s5132_s6 + $0xe0] sm:$0xff] }
 0x354   : > { %2040 = vmatpush.msrb.mxu3 %v3332_v56  ;;  %2113 = vmatpush.msra.mxu0 %v3341_v12 }
 0x355   : > { %3314 = vmatmul.msk.f32.gmra.mxu3 %vm1598_vm4, %v1491_v18  ;;  %3325 = vmatmul.msk.f32.gmra.mxu0 %vm1598_vm4, %v1512_v19  ;;  %v983_v18 = vld [vmem:[%s5131_s5 + $0x3e8] sm:$0xff] }
 0x356   : > { %2041 = vmatpush.msrb.mxu3 %v3331_v25 }
 0x357   : > { %3259 = vmatmul.msk.f32.gmra.mxu2 %vm984_vm3, %v967_v21 }
 0x358   : > { %v1760_v17 = vpop.f32.mrf.mxu3  ;;  %2042 = vmatpush.msrb.mxu3 %v3330_v30 }
 0x359   : > { %v4522_v58 = vadd.f32 %v1760_v17, %v4402_v24  ;;  %v974_v24 = vld [vmem:[%s5131_s5 + $0x3a0] sm:$0xff]  ;;  %v1323_v32 = vpop.f32.mrf.mxu1 }
 0x35a   : > { %v1514_v26 = vpop.f32.mrf.mxu2  ;;  %1367 = vmatmul.f32.gmra.mxu1 %v974_v24 }
 0x35b   : > { %v1515_v22 = vadd.f32 %v1514_v26, %v1308_v55 }
 0x35d   : > { %3315 = vmatmul.msk.f32.gmra.mxu3 %vm1598_vm4, %v1494_v27  ;;  %3326 = vmatmul.msk.f32.gmra.mxu0 %vm1598_vm4, %v1515_v22 }
 0x35f   : > { %3260 = vmatmul.msk.f32.gmra.mxu2 %vm984_vm3, %v969_v31 }
 0x360   : > { %v1763_v57 = vpop.f32.mrf.mxu3 }
 0x361   : > { %v4542_v28 = vadd.f32 %v1763_v57, %v4429_v34  ;;  %v1326_v5 = vpop.f32.mrf.mxu1 }
 0x362   : > { %v1517_v33 = vpop.f32.mrf.mxu2  ;;  %1370 = vmatmul.f32.gmra.mxu1 %v976_v39 }
 0x363   : > { %v1518_v35 = vadd.f32 %v1517_v33, %v1311_v60 }
 0x365   : > { %3316 = vmatmul.msk.f32.gmra.mxu3 %vm1598_vm4, %v1497_v50  ;;  %3327 = vmatmul.msk.f32.gmra.mxu0 %vm1598_vm4, %v1518_v35 }
 0x367   : > { %3261 = vmatmul.msk.f32.gmra.mxu2 %vm984_vm3, %v971_v40  ;;  %v3355_v40 = vld [vmem:[%s5132_s6 + $0x118] sm:$0xff] }
 0x368   : > { %v1766_v34 = vpop.f32.mrf.mxu3  ;;  %2181 = vmatpush.msra.mxu3 %v3355_v40 }
 0x369   : > { %v4556_v41 = vadd.f32 %v1766_v34, %v4444_v44  ;;  %v1329_v11 = vpop.f32.mrf.mxu1 }
 0x36a   : > { %v1520_v36 = vpop.f32.mrf.mxu2  ;;  %1373 = vmatmul.f32.gmra.mxu1 %v978_v3  ;;  %v3353_v3 = vld [vmem:[%s5132_s6 + $0x108] sm:$0xff] }
 0x36b   : > { %v1521_v45 = vadd.f32 %v1520_v36, %v1314_v37 }
 0x36d   : > { %3317 = vmatmul.msk.f32.gmra.mxu3 %vm1598_vm4, %v1500_v42  ;;  %3328 = vmatmul.msk.f32.gmra.mxu0 %vm1598_vm4, %v1521_v45  ;;  %v3354_v42 = vld [vmem:[%s5132_s6 + $0x110] sm:$0xff] }
 0x36e   : > { %2182 = vmatpush.msra.mxu3 %v3354_v42 }
 0x36f   : > { %3262 = vmatmul.msk.f32.gmra.mxu2 %vm984_vm3, %v973_v49 }
 0x370   : > { %v1769_v44 = vpop.f32.mrf.mxu3  ;;  %2183 = vmatpush.msra.mxu3 %v3353_v3 }
 0x371   : > { %v4570_v51 = vadd.f32 %v1769_v44, %v4459_v53  ;;  %v1332_v53 = vpop.f32.mrf.mxu1 }
 0x372   : > { %v1523_v46 = vpop.f32.mrf.mxu2  ;;  %1376 = vmatmul.f32.gmra.mxu1 %v980_v8 }
 0x373   : > { %v1524_v55 = vadd.f32 %v1523_v46, %v1317_v47 }
 0x375   : > { %3318 = vmatmul.msk.f32.gmra.mxu3 %vm1598_vm4, %v1503_v52  ;;  %3329 = vmatmul.msk.f32.gmra.mxu0 %vm1598_vm4, %v1524_v55 }
 0x377   : > { %3263 = vmatmul.msk.f32.gmra.mxu2 %vm984_vm3, %v975_v59 }
 0x378   : > { %v4591_v60 = vpop.f32.mrf.mxu3 }
 0x379   : > { %v1335_v29 = vpop.f32.mrf.mxu1 }
 0x37a   : > { %v1526_v61 = vpop.f32.mrf.mxu2  ;;  %1379 = vmatmul.f32.gmra.mxu1 %v982_v10 }
 0x37b   : > { %v1527_v62 = vadd.f32 %v1526_v61, %v1320_v23 }
 0x37d   : > { %3334 = vmatmul.msk.f32.vlgmr.msrb.gmra.mxu3 %vm1598_vm4, %v1527_v62 }
 0x37f   : > { %3264 = vmatmul.msk.f32.gmra.mxu2 %vm984_vm3, %v977_v54 }
 0x380   : > { %v4598_v2 = vpop.f32.mrf.mxu3 }
 0x381   : > { %v1338_v7 = vpop.f32.mrf.mxu1 }
 0x382   : > { %v1529_v1 = vpop.f32.mrf.mxu2 }
 0x383   : > { %v1530_v0 = vadd.f32 %v1529_v1, %v1323_v32 }
 0x385   : > { %3335 = vmatmul.msk.f32.gmra.mxu3 %vm1598_vm4, %v1530_v0 }
 0x387   : > { %3265 = vmatmul.msk.f32.gmra.mxu2 %vm984_vm3, %v979_v43 }
 0x388   : > { %v4620_v19 = vpop.f32.mrf.mxu3 }
 0x389   : > { %v1341_v20 = vpop.f32.mrf.mxu1 }
 0x38a   : > { %v1532_v38 = vpop.f32.mrf.mxu2 }
 0x38b   : > { %v1533_v37 = vadd.f32 %v1532_v38, %v1326_v5 }
 0x38d   : > { %3336 = vmatmul.msk.f32.gmra.mxu3 %vm1598_vm4, %v1533_v37 }
 0x38f   : > { %3266 = vmatmul.msk.f32.gmra.mxu2 %vm984_vm3, %v981_v6 }
 0x390   : > { %v4625_v56 = vpop.f32.mrf.mxu3 }
 0x391   : > { %v1344_v17 = vpop.f32.mrf.mxu1 }
 0x392   : > { %v1535_v9 = vpop.f32.mrf.mxu2 }
 0x393   : > { %v1536_v47 = vadd.f32 %v1535_v9, %v1329_v11  ;;  %v3352_v11 = vld [vmem:[%s5132_s6 + $0x100] sm:$0xff] }
 0x394   : > { %2184 = vmatpush.msra.mxu3 %v3352_v11 }
 0x395   : > { %3337 = vmatmul.msk.f32.gmra.mxu3 %vm1598_vm4, %v1536_v47 }
 0x397   : > { %3267 = vmatmul.msk.f32.gmra.mxu2 %vm984_vm3, %v983_v18 }
 0x398   : > { %v4628_v26 = vpop.f32.mrf.mxu3 }
 0x399   : > { %v1347_v22 = vpop.f32.mrf.mxu1 }
 0x39a   : > { %v1538_v21 = vpop.f32.mrf.mxu2 }
 0x39b   : > { %v1539_v16 = vadd.f32 %v1538_v21, %v1332_v53 }
 0x39d   : > { %3338 = vmatmul.msk.f32.gmra.mxu3 %vm1598_vm4, %v1539_v16 }
 0x3a0   : > { %v4631_v31 = vpop.f32.mrf.mxu3 }
 0x3a1   : > { %v1350_v32 = vpop.f32.mrf.mxu1 }
 0x3a2   : > { %v1541_v23 = vpop.f32.mrf.mxu2 }
 0x3a3   : > { %v1542_v25 = vadd.f32 %v1541_v23, %v1335_v29 }
 0x3a5   : > { %3339 = vmatmul.msk.f32.gmra.mxu3 %vm1598_vm4, %v1542_v25 }
 0x3a8   : > { %v4634_v35 = vpop.f32.mrf.mxu3 }
 0x3a9   : > { %v1353_v39 = vpop.f32.mrf.mxu1 }
 0x3aa   : > { %v1544_v27 = vpop.f32.mrf.mxu2 }
 0x3ab   : > { %v1545_v30 = vadd.f32 %v1544_v27, %v1338_v7 }
 0x3ad   : > { %3340 = vmatmul.msk.f32.gmra.mxu3 %vm1598_vm4, %v1545_v30 }
 0x3b0   : > { %v4641_v36 = vpop.f32.mrf.mxu3 }
 0x3b1   : > { %v1356_v45 = vpop.f32.mrf.mxu1 }
 0x3b2   : > { %v1547_v24 = vpop.f32.mrf.mxu2 }
 0x3b3   : > { %v1548_v57 = vadd.f32 %v1547_v24, %v1341_v20 }
 0x3b5   : > { %3345 = vmatmul.msk.f32.vlgmr.msra.gmra.mxu0 %vm1598_vm4, %v1548_v57 }
 0x3b8   : > { %v4653_v46 = vpop.f32.mrf.mxu3 }
 0x3b9   : > { %v1359_v55 = vpop.f32.mrf.mxu1 }
 0x3ba   : > { %v1550_v33 = vpop.f32.mrf.mxu2 }
 0x3bb   : > { %v1551_v50 = vadd.f32 %v1550_v33, %v1344_v17 }
 0x3bd   : > { %3346 = vmatmul.msk.f32.gmra.mxu0 %vm1598_vm4, %v1551_v50 }
 0x3c0   : > { %v4656_v53 = vpop.f32.mrf.mxu3 }
 0x3c1   : > { %v1362_v62 = vpop.f32.mrf.mxu1 }
 0x3c2   : > { %v1553_v34 = vpop.f32.mrf.mxu2 }
 0x3c3   : > { %v1554_v5 = vadd.f32 %v1553_v34, %v1347_v22 }
 0x3c5   : > { %3347 = vmatmul.msk.f32.gmra.mxu0 %vm1598_vm4, %v1554_v5 }
 0x3c8   : > { %v4659_v1 = vpop.f32.mrf.mxu3 }
 0x3c9   : > { %v1365_v29 = vpop.f32.mrf.mxu1 }
 0x3ca   : > { %v1556_v49 = vpop.f32.mrf.mxu2 }
 0x3cb   : > { %v1557_v44 = vadd.f32 %v1556_v49, %v1350_v32  ;;  %v4672_v32 = vpop.f32.mrf.mxu0 }
 0x3cd   : > { %3348 = vmatmul.msk.f32.gmra.mxu0 %vm1598_vm4, %v1557_v44 }
 0x3d0   : > { %v4663_v38 = vpop.f32.mrf.mxu3 }
 0x3d2   : > { %v1559_v52 = vpop.f32.mrf.mxu2 }
 0x3d3   : > { %v1560_v8 = vadd.f32 %v1559_v52, %v1353_v39  ;;  %v1976_v50 = vpop.f32.mrf.mxu0  ;;  %v3451_v52 = vld [vmem:[%s5137_s11 + $0x98] sm:$0xff] }
 0x3d4   : > { %2839 = vmatpush.msrb.mxu2 %v3451_v52 }
 0x3d5   : > { %3349 = vmatmul.msk.f32.gmra.mxu0 %vm1598_vm4, %v1560_v8 }
 0x3d7   : > { %v1368_v37 = vpop.f32.mrf.mxu1 }
 0x3d8   : > { %v4666_v4 = vpop.f32.mrf.mxu3 }
 0x3da   : > { %v1562_v59 = vpop.f32.mrf.mxu2 }
 0x3db   : > { %v1563_v61 = vadd.f32 %v1562_v59, %v1356_v45  ;;  %v1979_v40 = vpop.f32.mrf.mxu0 }
 0x3dd   : > { %3350 = vmatmul.msk.f32.gmra.mxu0 %vm1598_vm4, %v1563_v61 }
 0x3df   : > { %v1371_v14 = vpop.f32.mrf.mxu1 }
 0x3e0   : > { %v1911_v18 = vpop.f32.mrf.mxu3 }
 0x3e2   : > { %v1565_v10 = vpop.f32.mrf.mxu2 }
 0x3e3   : > { %v1566_v54 = vadd.f32 %v1565_v10, %v1359_v55  ;;  %v1982_v5 = vpop.f32.mrf.mxu0 }
 0x3e5   : > { %3351 = vmatmul.msk.f32.gmra.mxu0 %vm1598_vm4, %v1566_v54 }
 0x3e7   : > { %v1374_v20 = vpop.f32.mrf.mxu1 }
 0x3e8   : > { %v1914_v17 = vpop.f32.mrf.mxu3 }
 0x3ea   : > { %v1568_v0 = vpop.f32.mrf.mxu2 }
 0x3eb   : > { %v1569_v43 = vadd.f32 %v1568_v0, %v1362_v62  ;;  %v1985_v45 = vpop.f32.mrf.mxu0 }
 0x3ed   : > { %3356 = vmatmul.msk.f32.vlgmr.msra.gmra.mxu3 %vm1598_vm4, %v1569_v43 }
 0x3ef   : > { %v1377_v23 = vpop.f32.mrf.mxu1 }
 0x3f0   : > { %v1917_v22 = vpop.f32.mrf.mxu3 }
 0x3f2   : > { %v1571_v6 = vpop.f32.mrf.mxu2 }
 0x3f3   : > { %v1572_v7 = vadd.f32 %v1571_v6, %v1365_v29  ;;  %v1988_v49 = vpop.f32.mrf.mxu0 }
 0x3f5   : > { %3357 = vmatmul.msk.f32.gmra.mxu3 %vm1598_vm4, %v1572_v7  ;;  %v1786_v7 = vadd.f32 %v4598_v2, %v4488_v48  ;;  %v1854_v48 = vadd.f32 %v4631_v31, %v4556_v41 }
 0x3f7   : > { %v1380_v30 = vpop.f32.mrf.mxu1 }
 0x3f8   : > { %v1920_v33 = vpop.f32.mrf.mxu3 }
 0x3fa   : > { %v1574_v13 = vpop.f32.mrf.mxu2 }
 0x3fb   : > { %v1575_v9 = vadd.f32 %v1574_v13, %v1368_v37  ;;  %v1991_v11 = vpop.f32.mrf.mxu0 }
 0x3fd   : > { %3358 = vmatmul.msk.f32.gmra.mxu3 %vm1598_vm4, %v1575_v9  ;;  %v1787_v9 = vadd.f32 %v4620_v19, %v4502_v15  ;;  %v1853_v15 = vadd.f32 %v4628_v26, %v4542_v28  ;;  %v1925_v19 = vadd.f32 %v4666_v4, %v1854_v48  ;;  %v2242_v48 = vld [vmem:[%s5134_s8 + $0x50] sm:$0xff] }
 0x400   : > { %v4675_v39 = vpop.f32.mrf.mxu3 }
 0x402   : > { %v1577_v47 = vpop.f32.mrf.mxu2 }
 0x403   : > { %v1578_v12 = vadd.f32 %v1577_v47, %v1371_v14  ;;  %v1785_v14 = vadd.f32 %v4591_v60, %v4474_v63  ;;  %v1857_v47 = vadd.f32 %v4653_v46, %v1786_v7 }
 0x405   : > { %3359 = vmatmul.msk.f32.gmra.mxu3 %vm1598_vm4, %v1578_v12  ;;  %v1856_v12 = vadd.f32 %v4641_v36, %v1785_v14  ;;  %v2234_v14 = vld [vmem:[%s5134_s8 + $0x10] sm:$0xff] }
 0x408   : > { %v4677_v34 = vpop.f32.mrf.mxu3 }
 0x40a   : > { %v1580_v21 = vpop.f32.mrf.mxu2 }
 0x40b   : > { %v1581_v16 = vadd.f32 %v1580_v21, %v1374_v20  ;;  %v1858_v20 = vadd.f32 %v4656_v53, %v1787_v9  ;;  %v1928_v21 = vadd.f32 %v1917_v22, %v1857_v47  ;;  %v2235_v9 = vld [vmem:[%s5134_s8 + $0x18] sm:$0xff]  ;;  %v2236_v47 = vld [vmem:[%s5134_s8 + $0x20] sm:$0xff] }
 0x40d   : > { %3360 = vmatmul.msk.f32.gmra.mxu3 %vm1598_vm4, %v1581_v16  ;;  %v1855_v16 = vadd.f32 %v4634_v35, %v4570_v51  ;;  %v1999_v60 = vadd.f32 %v1988_v49, %v1928_v21  ;;  %v1924_v51 = vadd.f32 %v4663_v38, %v1853_v15  ;;  %v2238_v21 = vld [vmem:[%s5134_s8 + $0x30] sm:$0xff]  ;;  %v2245_v15 = vld [vmem:[%s5134_s8 + $0x68] sm:$0xff] }
 0x40f   : > { %v1926_v63 = vadd.f32 %v1911_v18, %v1855_v16  ;;  %v2239_v16 = vld [vmem:[%s5134_s8 + $0x38] sm:$0xff] }
 0x410   : > { %v2050_v42 = vpop.f32.mrf.mxu3 }
 0x412   : > { %v1583_v25 = vpop.f32.mrf.mxu2 }
 0x413   : > { %v1584_v27 = vadd.f32 %v1583_v25, %v1377_v23  ;;  %v1927_v23 = vadd.f32 %v1914_v17, %v1856_v12  ;;  %v1929_v25 = vadd.f32 %v1920_v33, %v1858_v20  ;;  %v1997_v17 = vadd.f32 %v1982_v5, %v1926_v63  ;;  %v3450_v12 = vld [vmem:[%s5137_s11 + $0x90] sm:$0xff]  ;;  %v2237_v20 = vld [vmem:[%s5134_s8 + $0x28] sm:$0xff]  ;;  %v2244_v63 = vld [vmem:[%s5134_s8 + $0x60] sm:$0xff] }
 0x414   : > { %2840 = vmatpush.msrb.mxu2 %v3450_v12 }
 0x415   : > { %3361 = vmatmul.msk.f32.gmra.mxu3 %vm1598_vm4, %v1584_v27  ;;  %v1998_v36 = vadd.f32 %v1985_v45, %v1927_v23  ;;  %v2000_v53 = vadd.f32 %v1991_v11, %v1929_v25  ;;  %v1852_v27 = vadd.f32 %v4625_v56, %v4522_v58  ;;  %v3499_v58 = vld [vmem:[%s5133_s7] ss:$0 sm:$0xff]  ;;  %v2241_v25 = vld [vmem:[%s5134_s8 + $0x48] sm:$0xff] }
 0x416   : > { %v2240_v23 = vld [vmem:[%s5134_s8 + $0x40] sm:$0xff] }
 0x417   : > { %v1923_v18 = vadd.f32 %v4659_v1, %v1852_v27  ;;  %v2247_v27 = vld [vmem:[%s5134_s8 + $0x78] sm:$0xff] }
 0x418   : > { %v2053_v3 = vpop.f32.mrf.mxu3 }
 0x419   : > { %v1994_v5 = vadd.f32 %v4672_v32, %v1923_v18 }
 0x41a   : > { %v1586_v24 = vpop.f32.mrf.mxu2 }
 0x41b   : > { %v1587_v57 = vadd.f32 %v1586_v24, %v1380_v30  ;;  %v1996_v30 = vadd.f32 %v1979_v40, %v1925_v19  ;;  %v2068_v24 = vadd.f32 %v2053_v3, %v1997_v17  ;;  %v2065_v52 = vadd.f32 %v4675_v39, %v1994_v5  ;;  %v3384_v19 = vld [vmem:[%s5135_s9 + $0x30] sm:$0xff]  ;;  %v2380_v17 = vld [vmem:[%s5135_s9 + $0x8] sm:$0xff]  ;;  %v3396_v5 = vld [vmem:[%s5135_s9 + $0x60] sm:$0xff] }
 0x41d   : > { %3362 = vmatmul.msk.f32.gmra.mxu3 %vm1598_vm4, %v1587_v57  ;;  %v1995_v57 = vadd.f32 %v1976_v50, %v1924_v51  ;;  %v2067_v45 = vadd.f32 %v2050_v42, %v1996_v30  ;;  %v2382_v51 = vld [vmem:[%s5135_s9 + $0x18] sm:$0xff]  ;;  %v2249_v30 = vld [vmem:[%s5134_s8 + $0x88] sm:$0xff] }
 0x420   : > { %v2056_v44 = vpop.f32.mrf.mxu3 }
 0x421   : > { %v2069_v22 = vadd.f32 %v2056_v44, %v1998_v36  ;;  %v2066_v44 = vadd.f32 %v4677_v34, %v1995_v57  ;;  %v3383_v36 = vld [vmem:[%s5135_s9 + $0x28] sm:$0xff] }
 0x422   : > { %v3391_v57 = vld [vmem:[%s5135_s9 + $0x48] sm:$0xff] }
 0x428   : > { %v2059_v55 = vpop.f32.mrf.mxu3 }
 0x429   : > { %v2070_v46 = vadd.f32 %v2059_v55, %v1999_v60  ;;  %v3385_v60 = vld [vmem:[%s5135_s9 + $0x38] sm:$0xff] }
 0x42a   : > { %3480 = vmatpush.msrb.mxu3 %v3385_v60 }
 0x42c   : > { %3481 = vmatpush.msrb.mxu3 %v3384_v19 }
 0x42e   : > { %3482 = vmatpush.msrb.mxu3 %v3383_v36 }
 0x430   : > { %v2062_v59 = vpop.f32.mrf.mxu3 }
 0x431   : > { %v2071_v41 = vadd.f32 %v2062_v59, %v2000_v53  ;;  %v3382_v53 = vld [vmem:[%s5135_s9 + $0x20] sm:$0xff] }
 0x432   : > { %v2115_v8 = vpop.f32.mrf.mxu0  ;;  %3483 = vmatpush.msrb.mxu3 %v3382_v53 }
 0x433   : > { %v2136_v59 = vadd.f32 %v2115_v8, %v2065_v52  ;;  %v3402_v52 = vld [vmem:[%s5135_s9 + $0x80] sm:$0xff] }
 0x434   : > { %2435 = vmatpush.msra.mxu3 %v2382_v51 }
 0x43a   : > { %v2118_v61 = vpop.f32.mrf.mxu0 }
 0x43b   : > { %v2137_v50 = vadd.f32 %v2118_v61, %v2066_v44 }
 0x442   : > { %v2121_v10 = vpop.f32.mrf.mxu0 }
 0x443   : > { %v2138_v1 = vadd.f32 %v2121_v10, %v2067_v45  ;;  %v3399_v45 = vld [vmem:[%s5135_s9 + $0x78] sm:$0xff] }
 0x44a   : > { %v2124_v29 = vpop.f32.mrf.mxu0 }
 0x44b   : > { %v2139_v49 = vadd.f32 %v2124_v29, %v2068_v24 }
 0x452   : > { %v2127_v43 = vpop.f32.mrf.mxu0 }
 0x453   : > { %v2140_v28 = vadd.f32 %v2127_v43, %v2069_v22  ;;  %v2379_v22 = vld [vmem:[%s5135_s9] sm:$0xff] }
 0x45a   : > { %v2130_v13 = vpop.f32.mrf.mxu0 }
 0x45b   : > { %v2141_v31 = vadd.f32 %v2130_v13, %v2070_v46  ;;  %v2233_v13 = vld [vmem:[%s5134_s8 + $0x8] sm:$0xff]  ;;  %v2246_v46 = vld [vmem:[%s5134_s8 + $0x70] sm:$0xff] }
 0x462   : > { %v2133_v35 = vpop.f32.mrf.mxu0 }
 0x463   : > { %v2142_v26 = vadd.f32 %v2133_v35, %v2071_v41  ;;  %v2381_v35 = vld [vmem:[%s5135_s9 + $0x10] sm:$0xff] }
 0x464   : > { %2436 = vmatpush.msra.mxu3 %v2381_v35 }
 0x466   : > { %2437 = vmatpush.msra.mxu3 %v2380_v17  ;;  %v3435_v17 = vld [vmem:[%s5137_s11 + $0x38] sm:$0xff] }
 0x468   : > { %2438 = vmatpush.msra.mxu3 %v2379_v22  ;;  %v3441_v22 = vld [vmem:[%s5137_s11 + $0x58] sm:$0xff] }
 0x470   : > { %v4682_v62 = vpop.f32.mrf.mxu3 }
 0x478   : > { %v2189_v54 = vpop.f32.mrf.mxu3 }
 0x479   : > { %v2208_v29 = vadd.f32 %v2189_v54, %v2137_v50  ;;  %v2232_v54 = vld [vmem:[%s5134_s8] sm:$0xff] }
 0x47b   : > { %v2219_v34 = vadd.f32 %v3499_v58, %v2208_v29  ;;  %v3411_v29 = vld [vmem:[%s5135_s9 + $0xb8] sm:$0xff] }
 0x480   : > { %v2192_v0 = vpop.f32.mrf.mxu3 }
 0x481   : > { %v2209_v55 = vadd.f32 %v2192_v0, %v2138_v1  ;;  %v3405_v1 = vld [vmem:[%s5135_s9 + $0x98] sm:$0xff] }
 0x483   : > { %v2220_v7 = vadd.f32 %v3499_v58, %v2209_v55  ;;  %v3417_v55 = vld [vmem:[%s5135_s9 + $0xd8] sm:$0xff] }
 0x488   : > { %v2195_v37 = vpop.f32.mrf.mxu3 }
 0x489   : > { %v2210_v40 = vadd.f32 %v2195_v37, %v2139_v49 }
 0x48b   : > { %v2221_v43 = vadd.f32 %v3499_v58, %v2210_v40 }
 0x490   : > { %v2198_v6 = vpop.f32.mrf.mxu3 }
 0x491   : > { %v2211_v56 = vadd.f32 %v2198_v6, %v2140_v28  ;;  %v2207_v6 = vadd.f32 %v4682_v62, %v2136_v59  ;;  %v3393_v28 = vld [vmem:[%s5135_s9 + $0x58] sm:$0xff]  ;;  %v3415_v59 = vld [vmem:[%s5135_s9 + $0xc8] sm:$0xff] }
 0x493   : > { %v2222_v42 = vadd.f32 %v3499_v58, %v2211_v56  ;;  %v2218_v37 = vadd.f32 %v3499_v58, %v2207_v6  ;;  %v3449_v56 = vld [vmem:[%s5137_s11 + $0x88] sm:$0xff] }
 0x494   : > { %2841 = vmatpush.msrb.mxu2 %v3449_v56  ;;  %v3455_v56 = vld [vmem:[%s5137_s11 + $0xb0] sm:$0xff] }
 0x498   : > { %v2201_v2 = vpop.f32.mrf.mxu3 }
 0x499   : > { %v2212_v4 = vadd.f32 %v2201_v2, %v2141_v31  ;;  %v2243_v2 = vld [vmem:[%s5134_s8 + $0x58] sm:$0xff]  ;;  %v2248_v31 = vld [vmem:[%s5134_s8 + $0x80] sm:$0xff] }
 0x49b   : > { %v2223_v3 = vadd.f32 %v3499_v58, %v2212_v4  ;;  %v3392_v4 = vld [vmem:[%s5135_s9 + $0x50] sm:$0xff] }
 0x4a0   : > { %v2204_v33 = vpop.f32.mrf.mxu3 }
 0x4a1   : > { %v2213_v38 = vadd.f32 %v2204_v33, %v2142_v26  ;;  %v3390_v33 = vld [vmem:[%s5135_s9 + $0x40] sm:$0xff] }
 0x4a3   : > { %v2224_v11 = vadd.f32 %v3499_v58, %v2213_v38  ;;  %v3398_v58 = vld [vmem:[%s5135_s9 + $0x70] sm:$0xff]  ;;  %v3397_v38 = vld [vmem:[%s5135_s9 + $0x68] sm:$0xff] }
 0x4a5   : > { %3559 = vtanh.f32 %v2224_v11  ;;  %v3403_v11 = vld [vmem:[%s5135_s9 + $0x88] sm:$0xff] }
 0x4a6   : > { %3561 = vtanh.f32 %v2223_v3  ;;  %v3404_v3 = vld [vmem:[%s5135_s9 + $0x90] sm:$0xff] }
 0x4a7   : > { %3563 = vtanh.f32 %v2222_v42  ;;  %v3416_v42 = vld [vmem:[%s5135_s9 + $0xd0] sm:$0xff] }
 0x4a8   : > { %3565 = vtanh.f32 %v2221_v43  ;;  %v3414_v43 = vld [vmem:[%s5135_s9 + $0xc0] sm:$0xff] }
 0x4a9   : > { %3567 = vtanh.f32 %v2220_v7  ;;  %v3410_v7 = vld [vmem:[%s5135_s9 + $0xb0] sm:$0xff] }
 0x4aa   : > { %3569 = vtanh.f32 %v2219_v34  ;;  %v3408_v34 = vld [vmem:[%s5135_s9 + $0xa0] sm:$0xff] }
 0x4ab   : > { %v3560_v32 = vpop.eup %3559  ;;  %3571 = vtanh.f32 %v2218_v37  ;;  %v3423_v37 = vld [vmem:[%s5135_s9 + $0xf8] sm:$0xff] }
 0x4ac   : > { %3363 = vmatpush.msk.msrb.mxu0 %vm721_vm1, %v3560_v32  ;;  %v3562_v10 = vpop.eup %3561  ;;  %v3409_v32 = vld [vmem:[%s5135_s9 + $0xa8] sm:$0xff] }
 0x4ad   : > { %v3564_v39 = vpop.eup %3563 }
 0x4ae   : > { %2318 = vmatpush.msrb.mxu0 %v3562_v10  ;;  %v3566_v8 = vpop.eup %3565 }
 0x4af   : > { %v3568_v61 = vpop.eup %3567 }
 0x4b0   : > { %2319 = vmatpush.msrb.mxu0 %v3564_v39  ;;  %v3570_v62 = vpop.eup %3569 }
 0x4b1   : > { %v3572_v0 = vpop.eup %3571 }
 0x4b2   : > { %2320 = vmatpush.msrb.mxu0 %v3566_v8  ;;  %v3422_v8 = vld [vmem:[%s5135_s9 + $0xf0] sm:$0xff] }
 0x4b4   : > { %2321 = vmatpush.msrb.mxu0 %v3568_v61  ;;  %v3421_v61 = vld [vmem:[%s5135_s9 + $0xe8] sm:$0xff] }
 0x4b6   : > { %2322 = vmatpush.msrb.mxu0 %v3570_v62  ;;  %v3420_v62 = vld [vmem:[%s5135_s9 + $0xe0] sm:$0xff] }
 0x4b8   : > { %2323 = vmatpush.msrb.mxu0 %v3572_v0  ;;  %v3429_v0 = vld [vmem:[%s5135_s9 + $0x118] sm:$0xff] }
 0x4b9   : > { %3364 = vmatmul.msk.f32.vlgmr.msrb.gmra.mxu0 %vm2250_vm5, %v2232_v54 }
 0x4ba   : > { %2406 = vmatpush.msra.mxu0 %v3385_v60 }
 0x4bc   : > { %2407 = vmatpush.msra.mxu0 %v3384_v19 }
 0x4be   : > { %2408 = vmatpush.msra.mxu0 %v3383_v36 }
 0x4c0   : > { %2409 = vmatpush.msra.mxu0 %v3382_v53 }
 0x4c1   : > { %3365 = vmatmul.msk.f32.gmra.mxu0 %vm2250_vm5, %v2233_v13  ;;  %v3428_v13 = vld [vmem:[%s5135_s9 + $0x110] sm:$0xff] }
 0x4c2   : > { %2613 = vmatpush.msrb.mxu0 %v3417_v55  ;;  %v3458_v55 = vld [vmem:[%s5137_s11 + $0xc0] sm:$0xff] }
 0x4c4   : > { %2614 = vmatpush.msrb.mxu0 %v3416_v42 }
 0x4c6   : > { %2615 = vmatpush.msrb.mxu0 %v3415_v59 }
 0x4c8   : > { %2616 = vmatpush.msrb.mxu0 %v3414_v43 }
 0x4c9   : > { %3366 = vmatmul.msk.f32.gmra.mxu0 %vm2250_vm5, %v2234_v14  ;;  %v3427_v14 = vld [vmem:[%s5135_s9 + $0x108] sm:$0xff] }
 0x4d1   : > { %3367 = vmatmul.msk.f32.gmra.mxu0 %vm2250_vm5, %v2235_v9  ;;  %v3426_v9 = vld [vmem:[%s5135_s9 + $0x100] sm:$0xff] }
 0x4d9   : > { %3368 = vmatmul.msk.f32.gmra.mxu0 %vm2250_vm5, %v2236_v47 }
 0x4e1   : > { %3369 = vmatmul.msk.f32.gmra.mxu0 %vm2250_vm5, %v2237_v20 }
 0x4e9   : > { %3370 = vmatmul.msk.f32.gmra.mxu0 %vm2250_vm5, %v2238_v21 }
 0x4f1   : > { %3371 = vmatmul.msk.f32.gmra.mxu0 %vm2250_vm5, %v2239_v16 }
 0x4f9   : > { %3372 = vmatmul.msk.f32.gmra.mxu0 %vm2250_vm5, %v2240_v23 }
 0x501   : > { %3373 = vmatmul.msk.f32.gmra.mxu0 %vm2250_vm5, %v2241_v25 }
 0x509   : > { %3374 = vmatmul.msk.f32.gmra.mxu0 %vm2250_vm5, %v2242_v48  ;;  %v3448_v48 = vld [vmem:[%s5137_s11 + $0x80] sm:$0xff] }
 0x50a   : > { %2842 = vmatpush.msrb.mxu2 %v3448_v48 }
 0x511   : > { %3375 = vmatmul.msk.f32.gmra.mxu0 %vm2250_vm5, %v2243_v2 }
 0x519   : > { %3376 = vmatmul.msk.f32.gmra.mxu0 %vm2250_vm5, %v2244_v63 }
 0x521   : > { %3377 = vmatmul.msk.f32.gmra.mxu0 %vm2250_vm5, %v2245_v15 }
 0x529   : > { %3378 = vmatmul.msk.f32.gmra.mxu0 %vm2250_vm5, %v2246_v46  ;;  %v3591_v46 = vmov 1.0  }
 0x52a   : > { %3058 = vmatpush.msrb.mxu1 %v3591_v46 }
 0x52c   : > { %3059 = vmatpush.msrb.mxu1 %v3591_v46 }
 0x52e   : > { %3060 = vmatpush.msrb.mxu1 %v3591_v46 }
 0x530   : > { %3061 = vmatpush.msrb.mxu1 %v3591_v46 }
 0x531   : > { %3379 = vmatmul.msk.f32.gmra.mxu0 %vm2250_vm5, %v2247_v27 }
 0x536   : > { %v2325_v41 = vpop.f32.mrf.mxu0 }
 0x539   : > { %3380 = vmatmul.msk.f32.gmra.mxu0 %vm2250_vm5, %v2248_v31 }
 0x53e   : > { %v2328_v18 = vpop.f32.mrf.mxu0 }
 0x541   : > { %3381 = vmatmul.msk.f32.gmra.mxu0 %vm2250_vm5, %v2249_v30  ;;  %v3440_v30 = vld [vmem:[%s5137_s11 + $0x50] sm:$0xff] }
 0x546   : > { %v2331_v24 = vpop.f32.mrf.mxu0 }
 0x549   : > { %3386 = vmatmul.msk.f32.vlgmr.msra.gmra.mxu0 %vm1598_vm4, %v2331_v24  ;;  %v3433_v24 = vld [vmem:[%s5137_s11 + $0x28] sm:$0xff] }
 0x54a   : > { %2685 = vmatpush.msra.mxu0 %v3429_v0 }
 0x54c   : > { %2686 = vmatpush.msra.mxu0 %v3428_v13 }
 0x54e   : > { %v2334_v26 = vpop.f32.mrf.mxu0  ;;  %2687 = vmatpush.msra.mxu0 %v3427_v14 }
 0x54f   : > { %3387 = vmatmul.msk.f32.vlgmr.msrb.gmra.mxu3 %vm1598_vm4, %v2334_v26  ;;  %v3432_v26 = vld [vmem:[%s5137_s11 + $0x20] sm:$0xff] }
 0x550   : > { %2469 = vmatpush.msrb.mxu3 %v3393_v28  ;;  %2688 = vmatpush.msra.mxu0 %v3426_v9  ;;  %v3439_v28 = vld [vmem:[%s5137_s11 + $0x48] sm:$0xff] }
 0x552   : > { %2470 = vmatpush.msrb.mxu3 %v3392_v4  ;;  %v3438_v4 = vld [vmem:[%s5137_s11 + $0x40] sm:$0xff] }
 0x554   : > { %2471 = vmatpush.msrb.mxu3 %v3391_v57 }
 0x556   : > { %v2337_v49 = vpop.f32.mrf.mxu0  ;;  %2472 = vmatpush.msrb.mxu3 %v3390_v33  ;;  %v2709_v33 = vld [vmem:[%s5137_s11 + $0x18] sm:$0xff] }
 0x557   : > { %3388 = vmatmul.msk.f32.vlgmr.msra.gmra.mxu3 %vm1598_vm4, %v2325_v41 }
 0x558   : > { %2505 = vmatpush.msra.mxu3 %v3399_v45  ;;  %v3456_v45 = vld [vmem:[%s5137_s11 + $0xb8] sm:$0xff] }
 0x55a   : > { %2506 = vmatpush.msra.mxu3 %v3398_v58  ;;  %v2708_v58 = vld [vmem:[%s5137_s11 + $0x10] sm:$0xff] }
 0x55c   : > { %2507 = vmatpush.msra.mxu3 %v3397_v38  ;;  %v3460_v38 = vld [vmem:[%s5137_s11 + $0xd0] sm:$0xff] }
 0x55e   : > { %v2340_v44 = vpop.f32.mrf.mxu0  ;;  %2508 = vmatpush.msra.mxu3 %v3396_v5 }
 0x55f   : > { %3389 = vmatmul.msk.f32.gmra.mxu3 %vm1598_vm4, %v2328_v18  ;;  %v3434_v18 = vld [vmem:[%s5137_s11 + $0x30] sm:$0xff] }
 0x566   : > { %v2343_v40 = vpop.f32.mrf.mxu0 }
 0x567   : > { %3394 = vmatmul.msk.f32.vlgmr.msrb.gmra.mxu3 %vm1598_vm4, %v2337_v49  ;;  %v3461_v49 = vld [vmem:[%s5137_s11 + $0xd8] sm:$0xff] }
 0x568   : > { %2541 = vmatpush.msrb.mxu3 %v3405_v1  ;;  %2897 = vmatpush.msra.mxu2 %v3461_v49  ;;  %v3454_v1 = vld [vmem:[%s5137_s11 + $0xa8] sm:$0xff] }
 0x569   : > { %v2976_v49 = vld [vmem:[%s5140_s14 + $0x8] sm:$0xff] }
 0x56a   : > { %2542 = vmatpush.msrb.mxu3 %v3404_v3  ;;  %v3459_v3 = vld [vmem:[%s5137_s11 + $0xc8] sm:$0xff]  ;;  %2898 = vmatpush.msra.mxu2 %v3460_v38 }
 0x56c   : > { %2543 = vmatpush.msrb.mxu3 %v3403_v11  ;;  %2899 = vmatpush.msra.mxu2 %v3459_v3 }
 0x56e   : > { %v2346_v50 = vpop.f32.mrf.mxu0  ;;  %2544 = vmatpush.msrb.mxu3 %v3402_v52  ;;  %v2706_v52 = vld [vmem:[%s5137_s11] sm:$0xff]  ;;  %2900 = vmatpush.msra.mxu2 %v3458_v55 }
 0x56f   : > { %3395 = vmatmul.msk.f32.gmra.mxu3 %vm1598_vm4, %v2340_v44  ;;  %v2707_v44 = vld [vmem:[%s5137_s11 + $0x8] sm:$0xff] }
 0x576   : > { %v2349_v6 = vpop.f32.mrf.mxu0 }
 0x577   : > { %3400 = vmatmul.msk.f32.vlgmr.msra.gmra.mxu3 %vm1598_vm4, %v2343_v40 }
 0x578   : > { %2577 = vmatpush.msra.mxu3 %v3411_v29 }
 0x57a   : > { %2578 = vmatpush.msra.mxu3 %v3410_v7 }
 0x57c   : > { %2579 = vmatpush.msra.mxu3 %v3409_v32 }
 0x57e   : > { %v2352_v10 = vpop.f32.mrf.mxu0  ;;  %2580 = vmatpush.msra.mxu3 %v3408_v34  ;;  %v3500_v34 = vld [vmem:[%s5136_s10] ss:$0 sm:$0xff] }
 0x57f   : > { %3401 = vmatmul.msk.f32.gmra.mxu3 %vm1598_vm4, %v2346_v50  ;;  %v3453_v50 = vld [vmem:[%s5137_s11 + $0xa0] sm:$0xff] }
 0x586   : > { %v2355_v39 = vpop.f32.mrf.mxu0 }
 0x587   : > { %3406 = vmatmul.msk.f32.vlgmr.msrb.gmra.mxu3 %vm1598_vm4, %v2349_v6 }
 0x588   : > { %2649 = vmatpush.msrb.mxu3 %v3423_v37 }
 0x58a   : > { %2650 = vmatpush.msrb.mxu3 %v3422_v8 }
 0x58c   : > { %2651 = vmatpush.msrb.mxu3 %v3421_v61 }
 0x58e   : > { %v2358_v54 = vpop.f32.mrf.mxu0  ;;  %2652 = vmatpush.msrb.mxu3 %v3420_v62 }
 0x58f   : > { %3407 = vmatmul.msk.f32.gmra.mxu3 %vm1598_vm4, %v2352_v10 }
 0x596   : > { %v2361_v47 = vpop.f32.mrf.mxu0 }
 0x597   : > { %3412 = vmatmul.msk.f32.vlgmr.msra.gmra.mxu3 %vm1598_vm4, %v2355_v39  ;;  %3418 = vmatmul.msk.f32.vlgmr.msrb.gmra.mxu0 %vm1598_vm4, %v2361_v47 }
 0x598   : > { %2731 = vmatpush.msra.mxu3 %v3435_v17  ;;  %2781 = vmatpush.msrb.mxu0 %v3441_v22  ;;  %v3463_v17 = vld [vmem:[%s5137_s11 + $0xe0] sm:$0xff] }
 0x59a   : > { %2732 = vmatpush.msra.mxu3 %v3434_v18  ;;  %2782 = vmatpush.msrb.mxu0 %v3440_v30  ;;  %v5038_v18 = vld [vmem:[#allocation2 + $0x18] sm:$0xff] }
 0x59b   : > { %v2978_v30 = vld [vmem:[%s5140_s14 + $0x18] sm:$0xff] }
 0x59c   : > { %2733 = vmatpush.msra.mxu3 %v3433_v24  ;;  %2783 = vmatpush.msrb.mxu0 %v3439_v28  ;;  %v2982_v24 = vmul.f32 %v2978_v30, %v5038_v18  ;;  %v2974_v28 = vld [vmem:[%s5139_s13 + $0x18] sm:$0xff] }
 0x59e   : > { %v2364_v12 = vpop.f32.mrf.mxu0  ;;  %2734 = vmatpush.msra.mxu3 %v3432_v26  ;;  %2784 = vmatpush.msrb.mxu0 %v3438_v4  ;;  %v5047_v26 = vld [vmem:[#allocation2 + $0x10] sm:$0xff]  ;;  %v2986_v4 = vadd.f32 %v2982_v24, %v2974_v28 }
 0x59f   : > { %3413 = vmatmul.msk.f32.gmra.mxu3 %vm1598_vm4, %v2358_v54  ;;  %3419 = vmatmul.msk.f32.gmra.mxu0 %vm1598_vm4, %v2364_v12  ;;  %v3446_v12 = vld [vmem:[%s5137_s11 + $0x78] sm:$0xff] }
 0x5a6   : > { %v2367_v20 = vpop.f32.mrf.mxu0 }
 0x5a7   : > { %3424 = vmatmul.msk.f32.vlgmr.msrb.gmra.mxu3 %vm1598_vm4, %v2367_v20 }
 0x5a8   : > { %2753 = vmatpush.msrb.mxu3 %v2709_v33  ;;  %v2973_v33 = vld [vmem:[%s5139_s13 + $0x10] sm:$0xff] }
 0x5aa   : > { %2754 = vmatpush.msrb.mxu3 %v2708_v58 }
 0x5ac   : > { %2755 = vmatpush.msrb.mxu3 %v2707_v44  ;;  %v5065_v44 = vld [vmem:[#allocation2] sm:$0xff] }
 0x5ae   : > { %v2370_v21 = vpop.f32.mrf.mxu0  ;;  %2756 = vmatpush.msrb.mxu3 %v2706_v52 }
 0x5af   : > { %3425 = vmatmul.msk.f32.gmra.mxu3 %vm1598_vm4, %v2370_v21  ;;  %v3471_v21 = vld [vmem:[%s5137_s11 + $0x118] sm:$0xff] }
 0x5b6   : > { %v2373_v16 = vpop.f32.mrf.mxu0 }
 0x5b7   : > { %3430 = vmatmul.msk.f32.vlgmr.msra.gmra.mxu0 %vm1598_vm4, %v2373_v16 }
 0x5b8   : > { %2868 = vmatpush.msra.mxu0 %v3456_v45  ;;  %v5056_v45 = vld [vmem:[#allocation2 + $0x8] sm:$0xff] }
 0x5b9   : > { %v2980_v38 = vmul.f32 %v2976_v49, %v5056_v45  ;;  %v3087_v49 = vstv %s3080_s1 }
 0x5ba   : > { %2869 = vmatpush.msra.mxu0 %v3455_v56 }
 0x5bc   : > { %2870 = vmatpush.msra.mxu0 %v3454_v1  ;;  %v2975_v1 = vld [vmem:[%s5140_s14] sm:$0xff] }
 0x5bd   : > { %v2979_v3 = vmul.f32 %v2975_v1, %v5065_v44 }
 0x5be   : > { %v2376_v23 = vpop.f32.mrf.mxu0  ;;  %2871 = vmatpush.msra.mxu0 %v3453_v50 }
 0x5bf   : > { %3431 = vmatmul.msk.f32.gmra.mxu0 %vm1598_vm4, %v2376_v23  ;;  %v3445_v23 = vld [vmem:[%s5137_s11 + $0x70] sm:$0xff] }
 0x5c6   : > { %v2411_v41 = vpop.f32.mrf.mxu0 }
 0x5d2   : > { %v2414_v25 = vpop.f32.mrf.mxu3 }
 0x5da   : > { %v2440_v2 = vpop.f32.mrf.mxu3 }
 0x5db   : > { %v2441_v5 = vadd.f32 %v2440_v2, %v2411_v41  ;;  %v3444_v2 = vld [vmem:[%s5137_s11 + $0x68] sm:$0xff] }
 0x5e2   : > { %v2443_v63 = vpop.f32.mrf.mxu3 }
 0x5e3   : > { %v2444_v60 = vadd.f32 %v2443_v63, %v2414_v25  ;;  %v3470_v25 = vld [vmem:[%s5137_s11 + $0x110] sm:$0xff]  ;;  %v3469_v63 = vld [vmem:[%s5137_s11 + $0x108] sm:$0xff] }
 0x5ea   : > { %v2474_v15 = vpop.f32.mrf.mxu3 }
 0x5eb   : > { %v2480_v11 = vadd.f32 %v2474_v15, %v2441_v5  ;;  %v2972_v5 = vld [vmem:[%s5139_s13 + $0x8] sm:$0xff] }
 0x5f2   : > { %v2477_v19 = vpop.f32.mrf.mxu3 }
 0x5f3   : > { %v4919_v36 = vadd.f32 %v2477_v19, %v2444_v60  ;;  %v3443_v60 = vld [vmem:[%s5137_s11 + $0x60] sm:$0xff] }
 0x5fa   : > { %v2510_v53 = vpop.f32.mrf.mxu3 }
 0x5fb   : > { %v2516_v42 = vadd.f32 %v2510_v53, %v2480_v11  ;;  %v2971_v11 = vld [vmem:[%s5139_s13] sm:$0xff] }
 0x5fc   : > { %v2983_v52 = vadd.f32 %v2979_v3, %v2971_v11 }
 0x602   : > { %v2513_v27 = vpop.f32.mrf.mxu3 }
 0x603   : > { %v2517_v8 = vadd.f32 %v2513_v27, %v4919_v36  ;;  %v3466_v36 = vld [vmem:[%s5137_s11 + $0xf8] sm:$0xff]  ;;  %v3468_v27 = vld [vmem:[%s5137_s11 + $0x100] sm:$0xff] }
 0x60a   : > { %v2546_v51 = vpop.f32.mrf.mxu3 }
 0x60b   : > { %v2552_v59 = vadd.f32 %v2546_v51, %v2516_v42  ;;  %v3465_v51 = vld [vmem:[%s5137_s11 + $0xf0] sm:$0xff] }
 0x612   : > { %v2549_v35 = vpop.f32.mrf.mxu3 }
 0x613   : > { %v2553_v61 = vadd.f32 %v2549_v35, %v2517_v8  ;;  %v3464_v35 = vld [vmem:[%s5137_s11 + $0xe8] sm:$0xff] }
 0x614   : > { %v2618_v57 = vpop.f32.mrf.mxu0 }
 0x61a   : > { %v2582_v31 = vpop.f32.mrf.mxu3 }
 0x61b   : > { %v2588_v43 = vadd.f32 %v2582_v31, %v2552_v59 }
 0x61c   : > { %v2621_v29 = vpop.f32.mrf.mxu0 }
 0x61d   : > { %v2624_v7 = vadd.f32 %v2618_v57, %v2588_v43 }
 0x622   : > { %v2585_v40 = vpop.f32.mrf.mxu3 }
 0x623   : > { %v2589_v62 = vadd.f32 %v2585_v40, %v2553_v61  ;;  %v2984_v40 = vadd.f32 %v2980_v38, %v2972_v5 }
 0x625   : > { %v2625_v13 = vadd.f32 %v2621_v29, %v2589_v62  ;;  %v2964_v62 = vld [vmem:[%s5158_s26] sm:$0x1] }
 0x62a   : > { %v2654_v6 = vpop.f32.mrf.mxu3 }
 0x62b   : > { %v2660_v32 = vadd.f32 %v2654_v6, %v2624_v7 }
 0x632   : > { %v2657_v0 = vpop.f32.mrf.mxu3 }
 0x633   : > { %v2661_v16 = vadd.f32 %v2657_v0, %v2625_v13 }
 0x634   : > { %v2690_v10 = vpop.f32.mrf.mxu0 }
 0x635   : > { %v2696_v37 = vadd.f32 %v2690_v10, %v2660_v32 }
 0x637   : > { %v2702_v39 = vadd.f32 %v3500_v34, %v2696_v37 }
 0x639   : > { %3573 = vtanh.f32 %v2702_v39 }
 0x63c   : > { %v2693_v20 = vpop.f32.mrf.mxu0 }
 0x63d   : > { %v2697_v48 = vadd.f32 %v2693_v20, %v2661_v16  ;;  %v3028_v16 = vld [vmem:[%s5159_s29 + $0x18] sm:$0xff] }
 0x63f   : > { %v3574_v54 = vpop.eup %3573  ;;  %v2703_v15 = vadd.f32 %v3500_v34, %v2697_v48  ;;  %v2987_v48 = vld [vmem:[%s581_s2] sm:$0x1]  ;;  %s3081_s2 = ssub.f32 1.0, %s3080_s1 }
 0x640   : > { %v2716_v14 = vrot.slane %v3574_v54, 1  ;;  %v2766_v9 = vrot.slane %v3574_v54, 2  ;;  %v2824_v47 = vrot.slane %v3574_v54, 4  ;;  %v2853_v19 = vrot.slane %v3574_v54, 5 }
 0x641   : > { %v2882_v53 = vrot.slane %v3574_v54, 6  ;;  %3575 = vtanh.f32 %v2703_v15  ;;  %v2795_v22 = vrot.slane %v3574_v54, 3  ;;  %v2911_v31 = vrot.slane %v3574_v54, 7 }
 0x642   : > { %3436 = vmatmul.msk.f32.vlgmr.msra.gmra.mxu3 %vm1598_vm4, %v2716_v14  ;;  %3442 = vmatmul.msk.f32.vlgmr.msrb.gmra.mxu0 %vm1598_vm4, %v2766_v9  ;;  %v3025_v14 = vld [vmem:[%s5159_s29] sm:$0xff]  ;;  %v3027_v9 = vld [vmem:[%s5159_s29 + $0x10] sm:$0xff] }
 0x643   : > { %3452 = vmatmul.msk.f32.vlgmr.msrb.gmra.mxu2 %vm1598_vm4, %v2824_v47  ;;  %2810 = vmatpush.msra.mxu3 %v3446_v12 }
 0x644   : > { %2955 = vmatpush.msrb.mxu2 %v3471_v21  ;;  %3004 = vmatpush.msrb.mxu0 %v2986_v4  ;;  %v3026_v21 = vld [vmem:[%s5159_s29 + $0x8] sm:$0xff] }
 0x645   : > { %2811 = vmatpush.msra.mxu3 %v3445_v23 }
 0x646   : > { %2956 = vmatpush.msrb.mxu2 %v3470_v25 }
 0x647   : > { %2812 = vmatpush.msra.mxu3 %v3444_v2  ;;  %v3576_v41 = vpop.eup %3575  ;;  %v2988_v2 = vmul.f32 1000.0, %v2987_v48 }
 0x648   : > { %2957 = vmatpush.msrb.mxu2 %v3469_v63 }
 0x649   : > { %2813 = vmatpush.msra.mxu3 %v3443_v60 }
 0x64a   : > { %3437 = vmatmul.msk.f32.vlgmr.msrb.gmra.mxu3 %vm1598_vm4, %v3574_v54  ;;  %3457 = vmatmul.msk.f32.vlgmr.msra.gmra.mxu0 %vm1598_vm4, %v2853_v19 }
 0x64b   : > { %3462 = vmatmul.msk.f32.vlgmr.msra.gmra.mxu2 %vm1598_vm4, %v2882_v53  ;;  %2926 = vmatpush.msrb.mxu3 %v3466_v36 }
 0x64c   : > { %2958 = vmatpush.msrb.mxu2 %v3468_v27 }
 0x64d   : > { %2927 = vmatpush.msrb.mxu3 %v3465_v51 }
 0x64f   : > { %2928 = vmatpush.msrb.mxu3 %v3464_v35 }
 0x651   : > { %2929 = vmatpush.msrb.mxu3 %v3463_v17 }
 0x652   : > { %3447 = vmatmul.msk.f32.vlgmr.msra.gmra.mxu3 %vm1598_vm4, %v2795_v22 }
 0x653   : > { %3472 = vmatmul.msk.f32.vlgmr.msrb.gmra.mxu2 %vm1598_vm4, %v3576_v41  ;;  %3484 = vmatpush.msra.mxu3 %v3591_v46 }
 0x655   : > { %3485 = vmatpush.msra.mxu3 %v3591_v46 }
 0x657   : > { %3486 = vmatpush.msra.mxu3 %v3591_v46 }
 0x659   : > { %3487 = vmatpush.msra.mxu3 %v3591_v46  ;;  %v2977_v46 = vld [vmem:[%s5140_s14 + $0x10] sm:$0xff] }
 0x65a   : > { %3467 = vmatmul.msk.f32.vlgmr.msrb.gmra.mxu3 %vm1598_vm4, %v2911_v31  ;;  %v2981_v57 = vmul.f32 %v2977_v46, %v5047_v26  ;;  %v3082_v31 = vstv %s3081_s2 }
 0x65b   : > { %v3085_v28 = vmul.f32 %v3082_v31, %v5047_v26  ;;  %v3084_v46 = vmul.f32 %v3082_v31, %v5056_v45  ;;  %v3083_v4 = vmul.f32 %v3082_v31, %v5065_v44  ;;  %v3086_v1 = vmul.f32 %v3082_v31, %v5038_v18 }
 0x65c   : > { %v2985_v56 = vadd.f32 %v2981_v57, %v2973_v33 }
 0x65e   : > { %3005 = vmatpush.msrb.mxu0 %v2985_v56 }
 0x660   : > { %3006 = vmatpush.msrb.mxu0 %v2984_v40 }
 0x662   : > { %3007 = vmatpush.msrb.mxu0 %v2983_v52 }
 0x6bf   : > { %v2786_v42 = vpop.f32.mrf.mxu0 }
 0x6c5   : > { %v2736_v58 = vpop.f32.mrf.mxu3 }
 0x6c6   : > { %v2844_v50 = vpop.f32.mrf.mxu2 }
 0x6c7   : > { %v2873_v34 = vpop.f32.mrf.mxu0 }
 0x6cd   : > { %v2758_v55 = vpop.f32.mrf.mxu3 }
 0x6ce   : > { %v2759_v59 = vadd.f32 %v2758_v55, %v2736_v58  ;;  %v2902_v43 = vpop.f32.mrf.mxu2 }
 0x6d0   : > { %v2789_v29 = vadd.f32 %v2786_v42, %v2759_v59 }
 0x6d5   : > { %v2815_v6 = vpop.f32.mrf.mxu3 }
 0x6d6   : > { %v2818_v7 = vadd.f32 %v2815_v6, %v2789_v29  ;;  %v2960_v61 = vpop.f32.mrf.mxu2 }
 0x6d8   : > { %v2847_v32 = vadd.f32 %v2844_v50, %v2818_v7 }
 0x6da   : > { %v2876_v10 = vadd.f32 %v2873_v34, %v2847_v32 }
 0x6dc   : > { %v2905_v37 = vadd.f32 %v2902_v43, %v2876_v10 }
 0x6dd   : > { %v2931_v39 = vpop.f32.mrf.mxu3 }
 0x6de   : > { %v2934_v8 = vadd.f32 %v2931_v39, %v2905_v37 }
 0x6e0   : > { %v2963_v54 = vadd.f32 %v2960_v61, %v2934_v8 }
 0x6e2   : > { %v2965_v0 = vadd.f32 %v2964_v62, %v2963_v54 }
 0x6e4   : > { %3577 = vtanh.f32 %v2965_v0 }
 0x6ea   : > { %v3578_v13 = vpop.eup %3577 }
 0x6eb   : > { %v3029_v47 = vperm.slane %v3578_v13, 0  ;;  %3473 = vmatmul.msk.f32.vlgmr.msrb.gmra.mxu0 %vm1598_vm4, %v3578_v13 }
 0x6ed   : > { %v3030_v12 = vmul.f32 %v3029_v47, %v3025_v14  ;;  %v3032_v20 = vmul.f32 %v3029_v47, %v3027_v9  ;;  %v3031_v23 = vmul.f32 %v3029_v47, %v3026_v21  ;;  %v3033_v25 = vmul.f32 %v3029_v47, %v3028_v16 }
 0x6ef   : > { %3474 = vmatmul.msk.f32.vlgmr.msrb.gmra.mxu1 %vm1598_vm4, %v3030_v12  ;;  %3476 = vmatmul.msk.f32.vlgmr.msra.gmra.mxu3 %vm1598_vm4, %v3032_v20 }
 0x6f7   : > { %3475 = vmatmul.msk.f32.gmra.mxu1 %vm1598_vm4, %v3031_v23  ;;  %3477 = vmatmul.msk.f32.gmra.mxu3 %vm1598_vm4, %v3033_v25 }
 0x768   : > { %v3009_v63 = vpop.f32.mrf.mxu0 }
 0x769   : > { %v3010_v60 = vadd.f32 %v3009_v63, %v2988_v2 }
 0x76b   : > { %v3013_v15 = vsel %vm3012_vm6, %v3010_v60, -inf }
 0x76c   : > { %3014 = vmax.xlane.f32.xlu0 %v3013_v15  ;;  %v3063_v17 = vpop.f32.mrf.mxu1 }
 0x772   : > { %v3069_v22 = vpop.f32.mrf.mxu3 }
 0x774   : > { %v3066_v57 = vpop.f32.mrf.mxu1 }
 0x77a   : > { %v3072_v33 = vpop.f32.mrf.mxu3 }
 0x7df   : > { %v3015_v19 = vpop.xlane.xlu0 %3014 }
 0x7e0   : > { %v3016_v36 = vsub.f32 %v3010_v60, %v3015_v19 }
 0x7e2   : > { %v3017_v53 = vmul.f32 1.442695, %v3016_v36 }
 0x7e4   : > { %3579 = vpow2.f32 %v3017_v53 }
 0x7ea   : > { %v3580_v27 = vpop.eup %3579 }
 0x7eb   : > { %v3019_v51 = vsel %vm3012_vm6, %v3580_v27, 0.0 }
 0x7ec   : > { %3020 = vadd.xlane.f32.xlu0 %v3019_v51 }
 0x85f   : > { %v3021_v35 = vpop.xlane.xlu0 %3020 }
 0x860   : > { %3581 = vrcp.f32 %v3021_v35 }
 0x866   : > { %v3582_v41 = vpop.eup %3581 }
 0x867   : > { %v3023_v30 = vmul.f32 %v3582_v41, %v3580_v27 }
 0x869   : > { %3024 = vst.msk [vmem:[%s584_s25] sm:$0x1] %vm3012_vm6, %v3023_v30  ;;  %v3075_v24 = vperm.slane %v3023_v30, 0 }
 0x86b   : > { %v3076_v58 = vmul.f32 %v3075_v24, %v3063_v17  ;;  %v3077_v56 = vmul.f32 %v3075_v24, %v3066_v57  ;;  %v3078_v38 = vmul.f32 %v3075_v24, %v3069_v22  ;;  %v3079_v5 = vmul.f32 %v3075_v24, %v3072_v33 }
 0x86d   : > { %v3088_v40 = vmul.f32 %v3087_v49, %v3076_v58  ;;  %v3089_v3 = vmul.f32 %v3087_v49, %v3077_v56  ;;  %v3090_v11 = vmul.f32 %v3087_v49, %v3078_v38  ;;  %v3091_v52 = vmul.f32 %v3087_v49, %v3079_v5 }
 0x86f   : > { %v3092_v50 = vadd.f32 %v3088_v40, %v3083_v4  ;;  %v3093_v26 = vadd.f32 %v3089_v3, %v3084_v46  ;;  %v3094_v55 = vadd.f32 %v3090_v11, %v3085_v28  ;;  %v3095_v45 = vadd.f32 %v3091_v52, %v3086_v1 }
 0x871   : > { %3097 = vst.msk [vmem:[#allocation2] sm:$0xff] %vm3096_vm7, %v3092_v50 }
 0x872   : > { %3098 = vst.msk [vmem:[#allocation2 + $0x8] sm:$0xff] %vm3096_vm7, %v3093_v26 }
 0x873   : > { %3099 = vst.msk [vmem:[#allocation2 + $0x10] sm:$0xff] %vm3096_vm7, %v3094_v55 }
 0x874   : > { %3100 = vst.msk [vmem:[#allocation2 + $0x18] sm:$0xff] %vm3096_vm7, %v3095_v45 }
 0x875   : > { %3101 = vst.msk [vmem:[%s5161_s27] sm:$0xff] %vm3096_vm7, %v3092_v50 }
 0x876   : > { %3102 = vst.msk [vmem:[%s5161_s27 + $0x8] sm:$0xff] %vm3096_vm7, %v3093_v26 }
 0x877   : > { %3103 = vst.msk [vmem:[%s5161_s27 + $0x10] sm:$0xff] %vm3096_vm7, %v3094_v55 }
 0x878   : > { %3104 = vst.msk [vmem:[%s5161_s27 + $0x18] sm:$0xff] %vm3096_vm7, %v3095_v45 }
 0x879 PF: > { %s5162_s30 = sld [smem:[#allocation4_spill]] }
 0x87f   : > { %s30_s30 = sadd.s32 1, %s5162_s30  }
 0x880   : > { %p27_p5 = scmp.ge.s32.totalorder %s30_s30, 10  }
 0x882   :  { %29 = sbr.rel (!%p27_p5) target bundleno = 14 (0xe), region = 157 }

</bundles_post_ra>
